<compile_context>
chip_gen: v7x
topology: tpu7x:2x2x1
jax: 0.10.0
libtpu: 0.0.40
codegen_flags: <defaults>
</compile_context>

<pallas_src>
import math

import jax
import jax.numpy as jnp
from jax.experimental import pallas as pl
from jax.experimental.pallas import tpu as pltpu

BBOX_XFORM_CLIP = math.log(1000.0 / 16.0)   # same clamp as maskrcnn BoxCoder
TO_REMOVE = 1.0                              # legacy "+1" box-size convention


# ---------------------------------------------------------------------------
# Kernel 1: RPNHead forward (conv3x3 + bias + ReLU, fused cls/bbox 1x1 conv)
# ---------------------------------------------------------------------------
def _rpn_head_kernel(xp_ref, w9_ref, bconv_ref, wheadT_ref, bhead_ref, out_ref):
    # xp_ref: (TH+2, W+2, C) bf16 padded feature slab (1-row / 1-col halo).
    thp2, wp2, c = xp_ref.shape
    th, w = thp2 - 2, wp2 - 2
    tp = th * w

    xp = xp_ref[...]                                        # one VMEM load
    acc = jnp.zeros((tp, c), jnp.float32)
    # 3x3 conv as nine shifted matmuls (implicit im2col in VMEM, MXU bf16).
    for k in range(9):
        ky, kx = divmod(k, 3)
        x_tap = xp[ky:ky + th, kx:kx + w, :].reshape(tp, c)
        acc = acc + jnp.dot(x_tap, w9_ref[k],
                            preferred_element_type=jnp.float32)

    t = jnp.maximum(acc + bconv_ref[...], 0.0)              # bias + ReLU (f32)
    t_tr = t.T.astype(jnp.bfloat16)                         # (C, TP) lane-dense
    # Fused cls+bbox head: (16, C) @ (C, TP) -> (16, TP), unmasked store.
    out = jnp.dot(wheadT_ref[...], t_tr, preferred_element_type=jnp.float32)
    out_ref[...] = out + bhead_ref[...]


def _rpn_head_pallas(x_tiles, w9, bconv, w_head_t, b_head):
    """x_tiles: [N, R, TH+2, W+2, C] bf16 -> fused head output [N, OC, R*TH*W]."""
    n, r, thp2, wp2, c = x_tiles.shape
    th, w = thp2 - 2, wp2 - 2
    tp = th * w
    p = r * tp
    out_ch = w_head_t.shape[0]

    return pl.pallas_call(
        _rpn_head_kernel,
        out_shape=jax.ShapeDtypeStruct((n, out_ch, p), jnp.float32),
        grid_spec=pltpu.PrefetchScalarGridSpec(
            num_scalar_prefetch=0,
            grid=(n, r),
            in_specs=[
                pl.BlockSpec((None, None, thp2, wp2, c),
                             lambda i, j: (i, j, 0, 0, 0)),
                # Constant-index weight/bias blocks: never re-DMA'd by the
                # pipeliner (small enough that double-buffer VMEM is moot).
                pl.BlockSpec((9, c, c), lambda i, j: (0, 0, 0)),
                pl.BlockSpec((1, c), lambda i, j: (0, 0)),
                pl.BlockSpec((out_ch, c), lambda i, j: (0, 0)),
                pl.BlockSpec((out_ch, 1), lambda i, j: (0, 0)),
            ],
            out_specs=pl.BlockSpec((None, out_ch, tp), lambda i, j: (i, 0, j)),
        ),
        compiler_params=pltpu.CompilerParams(
            dimension_semantics=("parallel", "parallel"),
            vmem_limit_bytes=32 * 1024 * 1024),
    )(x_tiles, w9, bconv, w_head_t, b_head)


def _pick_tile_rows(h, w, max_tp=2048):
    """Row-tile height th | H.  Prefers >=2 spatial tiles per image (v7x
    megacore balance) and the largest tile with th*W % 128 == 0 (lane-dense
    output blocks) within max_tp positions."""
    best = None
    for th in range(1, h + 1):
        if h % th:
            continue
        tp = th * w
        if tp > max_tp:
            continue
        r = h // th
        if r > 1 and tp % 128 != 0:
            continue                      # non-final blocks stay lane-aligned
        key = (r >= 2, tp)
        if best is None or key > best[0]:
            best = (key, th)
    if best is None:
        # TODO(synk): pad H*W (ragged last tile) for FPN levels whose whole
        # image exceeds max_tp and has no lane-aligned row divisor.
        raise ValueError(f"no valid row tile for H={h}, W={w}")
    return best[1]


def rpn_head_forward(features, params, *, max_tp=2048):
    """Mirrors RPNHead.forward: list of NHWC features -> (logits, bbox_reg)
    per level, in lane-dense layout logits [N, A, H*W], bbox [N, 4A, H*W]
    (channel on sublanes, spatial on lanes)."""
    w_conv, b_conv, w_cls, b_cls, w_box, b_box = params
    c = w_conv.shape[2]
    a = w_cls.shape[1]
    out_ch = a + 4 * a
    out_ch_pad = ((out_ch + 7) // 8) * 8

    # Fused + transposed head weights, padded to a multiple of 8 sublanes.
    w_head = jnp.concatenate([w_cls, w_box], axis=1)                 # (C, 5A)
    w_head = jnp.pad(w_head, ((0, 0), (0, out_ch_pad - out_ch)))
    w_head_t = w_head.T.astype(jnp.bfloat16)                         # (OC, C)
    b_head = jnp.pad(jnp.concatenate([b_cls, b_box]),
                     (0, out_ch_pad - out_ch)).astype(jnp.float32)[:, None]
    w9 = w_conv.reshape(9, c, w_conv.shape[3]).astype(jnp.bfloat16)  # (9,Ci,Co)
    bconv2 = b_conv[None, :].astype(jnp.float32)                     # (1, C)

    logits_out, bbox_out = [], []
    for feat in features:
        n, h, w, cf = feat.shape
        assert cf == c
        th = _pick_tile_rows(h, w, max_tp=max_tp)
        r = h // th
        # Zero-pad once (SAME conv) and cut overlapping row slabs with a
        # 1-row halo: ~6% duplicated HBM bytes vs. 9x for a full im2col.
        xp = jnp.pad(feat, ((0, 0), (1, 1), (1, 1), (0, 0))).astype(jnp.bfloat16)
        x_tiles = jnp.stack([xp[:, i * th:i * th + th + 2] for i in range(r)],
                            axis=1)                     # [N, R, TH+2, W+2, C]
        out = _rpn_head_pallas(x_tiles, w9, bconv2, w_head_t, b_head)
        logits_out.append(out[:, :a, :])                # [N, A, P]
        bbox_out.append(out[:, a:a + 4 * a, :])         # [N, 4A, P]
    # TODO(synk): the CUDA multi-stream per-FPN-level overlap in the PyTorch
    # module has no TPU equivalent; grid parallelism covers it.
    return logits_out, bbox_out


# ---------------------------------------------------------------------------
# Kernel 2: proposal decode on the top-k selected anchors
# ---------------------------------------------------------------------------
def _rpn_decode_kernel(ad_ref, logit_ref, clamp_ref, boxes_ref, scores_ref):
    """Sigmoid(selected logits) + BoxCoder(1,1,1,1).decode + clip_to_image,
    all N images in one step, vectorized on (x,y)/(w,h) sublane pairs."""
    ad = ad_ref[...]                       # (N, 8, K): rows 0-3 anchors, 4-7 deltas
    xy1 = ad[:, 0:2, :]
    xy2 = ad[:, 2:4, :]
    dxy = ad[:, 4:6, :]
    dwh = jnp.minimum(ad[:, 6:8, :], BBOX_XFORM_CLIP)

    wh = xy2 - xy1 + TO_REMOVE
    ctr = xy1 + 0.5 * wh
    pred_ctr = dxy * wh + ctr              # BoxCoder weights (1,1,1,1): no div
    half = 0.5 * (jnp.exp(dwh) * wh)       # single exp on the packed (2,K) pair

    lo = pred_ctr - half                   # rows: x1, y1
    hi = pred_ctr + half - 1.0             # rows: x2, y2
    boxes = jnp.concatenate([lo, hi], axis=1)              # (N, 4, K)
    boxes_ref[...] = jnp.clip(boxes, 0.0, clamp_ref[...])  # one store
    scores_ref[...] = jax.nn.sigmoid(logit_ref[...])


def _rpn_decode_topk(ad, logits_sel, clamp):
    """ad: [N,8,K] packed anchors+deltas; logits_sel: [N,1,K]; clamp: [N,4,1]."""
    n, _, k = ad.shape
    return pl.pallas_call(
        _rpn_decode_kernel,
        out_shape=(
            jax.ShapeDtypeStruct((n, 4, k), jnp.float32),
            jax.ShapeDtypeStruct((n, 1, k), jnp.float32),
        ),
        grid_spec=pltpu.PrefetchScalarGridSpec(
            num_scalar_prefetch=0,
            grid=(1,),
            in_specs=[
                pl.BlockSpec((n, 8, k), lambda i: (0, 0, 0)),
                pl.BlockSpec((n, 1, k), lambda i: (0, 0, 0)),
                pl.BlockSpec((n, 4, 1), lambda i: (0, 0, 0)),
            ],
            out_specs=[
                pl.BlockSpec((n, 4, k), lambda i: (0, 0, 0)),
                pl.BlockSpec((n, 1, k), lambda i: (0, 0, 0)),
            ],
        ),
        compiler_params=pltpu.CompilerParams(
            dimension_semantics=("arbitrary",)),
    )(ad, logits_sel, clamp)


def rpn_select_proposals(objectness_logits, bbox_deltas, anchors,
                         image_sizes_hw, pre_nms_top_n=1000):
    """Top-k on RAW logits (sigmoid is monotone), decode only selected anchors.
    objectness_logits: [N, A]; bbox_deltas/anchors: [N, A, 4];
    image_sizes_hw: [N, 2] as (height, width), maskrcnn ImageList convention."""
    n, atot = objectness_logits.shape
    k = min(pre_nms_top_n, atot)
    kp = ((k + 127) // 128) * 128                       # lane-align K
    top_logits, top_idx = jax.lax.top_k(objectness_logits, k)          # [N, K]
    # TODO(synk): fuse per-tile partial top-k into the head kernel and replace
    # these XLA gathers with a scalar-prefetch DMA gather that writes the
    # packed [N,8,K] stream directly (removes the full [N,Atot] writeback).
    a_sel = jnp.take_along_axis(anchors, top_idx[:, :, None], axis=1)
    d_sel = jnp.take_along_axis(bbox_deltas, top_idx[:, :, None], axis=1)
    # One lane-dense stream: rows = (x1,y1,x2,y2, dx,dy,dw,dh), K on lanes.
    ad = jnp.transpose(jnp.concatenate([a_sel, d_sel], axis=2), (0, 2, 1))
    logits_sel = top_logits[:, None, :]
    if kp != k:
        ad = jnp.pad(ad, ((0, 0), (0, 0), (0, kp - k)))
        logits_sel = jnp.pad(logits_sel, ((0, 0), (0, 0), (0, kp - k)),
                             constant_values=-1e30)
    # clip_to_image bounds: x -> width-1, y -> height-1 (sizes are (h, w)).
    wmax = image_sizes_hw[:, 1].astype(jnp.float32) - TO_REMOVE
    hmax = image_sizes_hw[:, 0].astype(jnp.float32) - TO_REMOVE
    clamp = jnp.stack([wmax, hmax, wmax, hmax], axis=1)[:, :, None]   # [N,4,1]
    boxes, scores = _rpn_decode_topk(ad, logits_sel, clamp)
    # TODO(synk): remove_small_boxes + per-image NMS + post_nms_top_n are
    # data-dependent sequential ops with no clean Pallas equivalent.
    return boxes[:, :, :k], scores[:, 0, :k], top_idx


# ---------------------------------------------------------------------------
# Pure-JAX references (mirror the kernel's bf16 quantization points)
# ---------------------------------------------------------------------------
def _rpn_head_reference(x, w_conv, b_conv, w_cls, b_cls, w_box, b_box):
    hi = jax.lax.Precision.HIGHEST
    bf = lambda v: v.astype(jnp.bfloat16).astype(jnp.float32)
    t = jax.lax.conv_general_dilated(
        bf(x), bf(w_conv), window_strides=(1, 1), padding="SAME",
        dimension_numbers=("NHWC", "HWIO", "NHWC"), precision=hi)
    t = jnp.maximum(t + b_conv, 0.0)
    t = bf(t)
    logits = jnp.einsum("nhwc,ca->nhwa", t, bf(w_cls), precision=hi) + b_cls
    bbox = jnp.einsum("nhwc,cd->nhwd", t, bf(w_box), precision=hi) + b_box
    n, h, w, _ = x.shape
    # Return in the kernel's lane-dense layout: [N, A, P] / [N, 4A, P].
    logits = logits.reshape(n, h * w, -1).transpose(0, 2, 1)
    bbox = bbox.reshape(n, h * w, -1).transpose(0, 2, 1)
    return logits, bbox


def _decode_reference(anchors_sel, deltas_sel, logits_sel, image_sizes_hw):
    ax1, ay1, ax2, ay2 = [anchors_sel[..., i] for i in range(4)]
    dx, dy = deltas_sel[..., 0], deltas_sel[..., 1]
    dw = jnp.minimum(deltas_sel[..., 2], BBOX_XFORM_CLIP)
    dh = jnp.minimum(deltas_sel[..., 3], BBOX_XFORM_CLIP)
    w = ax2 - ax1 + TO_REMOVE
    h = ay2 - ay1 + TO_REMOVE
    cx = ax1 + 0.5 * w
    cy = ay1 + 0.5 * h
    pcx = dx * w + cx
    pcy = dy * h + cy
    pw = jnp.exp(dw) * w
    ph = jnp.exp(dh) * h
    x1 = pcx - 0.5 * pw
    y1 = pcy - 0.5 * ph
    x2 = pcx + 0.5 * pw - 1.0
    y2 = pcy + 0.5 * ph - 1.0
    wi = image_sizes_hw[:, 1:2].astype(jnp.float32) - TO_REMOVE
    hi_ = image_sizes_hw[:, 0:1].astype(jnp.float32) - TO_REMOVE
    x1 = jnp.clip(x1, 0.0, wi)
    y1 = jnp.clip(y1, 0.0, hi_)
    x2 = jnp.clip(x2, 0.0, wi)
    y2 = jnp.clip(y2, 0.0, hi_)
    boxes = jnp.stack([x1, y1, x2, y2], axis=1)            # [N, 4, K]
    return boxes, jax.nn.sigmoid(logits_sel)


# ---------------------------------------------------------------------------
if __name__ == "__main__":
    N, H, W, C, A = 2, 16, 16, 128, 3          # small but lane-aligned demo
    P = H * W
    Atot = P * A

    key = jax.random.PRNGKey(0)
    ks = jax.random.split(key, 9)

    x = jax.random.normal(ks[0], (N, H, W, C), jnp.float32)              # NHWC
    # Module init: std=0.01 weights (biases randomized to exercise the path).
    w_conv = 0.01 * jax.random.normal(ks[1], (3, 3, C, C), jnp.float32)  # HWIO
    b_conv = 0.01 * jax.random.normal(ks[2], (C,), jnp.float32)
    w_cls = 0.01 * jax.random.normal(ks[3], (C, A), jnp.float32)
    b_cls = 0.01 * jax.random.normal(ks[4], (A,), jnp.float32)
    w_box = 0.01 * jax.random.normal(ks[5], (C, 4 * A), jnp.float32)
    b_box = 0.01 * jax.random.normal(ks[6], (4 * A,), jnp.float32)
    params = (w_conv, b_conv, w_cls, b_cls, w_box, b_box)

    # ---- RPNHead forward (the module's forward pass) ----
    logits_list, bbox_list = rpn_head_forward([x], params)
    logits_hd, bbox_hd = logits_list[0], bbox_list[0]       # [N,A,P], [N,4A,P]
    jax.block_until_ready((logits_hd, bbox_hd))

    ref_logits, ref_bbox = _rpn_head_reference(x, *params)
    assert logits_hd.shape == (N, A, P) and bbox_hd.shape == (N, 4 * A, P)
    assert jnp.allclose(logits_hd, ref_logits, rtol=1e-2, atol=1e-3)
    assert jnp.allclose(bbox_hd, ref_bbox, rtol=1e-2, atol=1e-3)

    # ---- Proposal decode on the head outputs (ordering: (a, h*w)) ----
    obj_flat = logits_hd.reshape(N, Atot)
    deltas_flat = bbox_hd.reshape(N, A, 4, P).transpose(0, 1, 3, 2).reshape(N, Atot, 4)
    # TODO(synk): anchors come from the AnchorGenerator in maskrcnn; synthetic
    # per-anchor boxes (same (a, h*w) ordering) are used for the demo.
    a_xy = jax.random.uniform(ks[7], (N, Atot, 2), jnp.float32, 0.0, 500.0)
    a_wh = jax.random.uniform(ks[8], (N, Atot, 2), jnp.float32, 8.0, 128.0)
    anchors = jnp.concatenate([a_xy, a_xy + a_wh], axis=2)          # [N,Atot,4]
    image_sizes_hw = jnp.array([[600, 800], [480, 640]], dtype=jnp.int32)  # (h,w)

    boxes, scores, top_idx = rpn_select_proposals(
        obj_flat, deltas_flat, anchors, image_sizes_hw, pre_nms_top_n=128)
    jax.block_until_ready((boxes, scores))

    K = top_idx.shape[1]
    a_sel = jnp.take_along_axis(anchors, top_idx[:, :, None], axis=1)
    d_sel = jnp.take_along_axis(deltas_flat, top_idx[:, :, None], axis=1)
    l_sel = jnp.take_along_axis(obj_flat, top_idx, axis=1)
    ref_boxes, ref_scores = _decode_reference(a_sel, d_sel, l_sel, image_sizes_hw)

    assert boxes.shape == (N, 4, K) and scores.shape == (N, K)
    assert jnp.allclose(boxes, ref_boxes, rtol=1e-5, atol=1e-3)
    assert jnp.allclose(scores, ref_scores, rtol=1e-5, atol=1e-5)

    print("KERNEL_OK")
</pallas_src>

<mosaic_0001>
module attributes {stable_mosaic.version = 11 : i64} {
  func.func @_rpn_head_kernel(%arg0: i32, %arg1: i32, %arg2: memref<1x1x10x18x128xbf16, #tpu.memory_space<vmem>>, %arg3: memref<9x128x128xbf16, #tpu.memory_space<vmem>>, %arg4: memref<1x128xf32, #tpu.memory_space<vmem>>, %arg5: memref<16x128xbf16, #tpu.memory_space<vmem>>, %arg6: memref<16x1xf32, #tpu.memory_space<vmem>>, %arg7: memref<1x16x128xf32, #tpu.memory_space<vmem>>) attributes {dimension_semantics = [#tpu.dimension_semantics<parallel>, #tpu.dimension_semantics<parallel>], iteration_bounds = array<i64: 2, 2>, scalar_prefetch = 0 : i64, scratch_operands = 0 : i64, tpu.core_type = #tpu.core_type<tc>, window_params = [{transform_indices = @transform_0, window_bounds = array<i64: 1, 1, 10, 18, 128>}, {pipeline_mode = #tpu.pipeline_mode<synchronous>, transform_indices = @transform_1, window_bounds = array<i64: 9, 128, 128>}, {pipeline_mode = #tpu.pipeline_mode<synchronous>, transform_indices = @transform_2, window_bounds = array<i64: 1, 128>}, {pipeline_mode = #tpu.pipeline_mode<synchronous>, transform_indices = @transform_3, window_bounds = array<i64: 16, 128>}, {pipeline_mode = #tpu.pipeline_mode<synchronous>, transform_indices = @transform_4, window_bounds = array<i64: 16, 1>}, {transform_indices = @transform_5, window_bounds = array<i64: 1, 16, 128>}]} {
    %c0 = arith.constant 0 : index
    %c0_0 = arith.constant 0 : index
    %c0_1 = arith.constant 0 : index
    %c0_2 = arith.constant 0 : index
    %c0_3 = arith.constant 0 : index
    %0 = vector.load %arg2[%c0, %c0_0, %c0_1, %c0_2, %c0_3] : memref<1x1x10x18x128xbf16, #tpu.memory_space<vmem>>, vector<1x1x10x18x128xbf16>
    %1 = vector.shape_cast %0 : vector<1x1x10x18x128xbf16> to vector<10x18x128xbf16>
    %cst = arith.constant 0.000000e+00 : f32
    %2 = vector.broadcast %cst : f32 to vector<128x128xf32>
    %3 = vector.extract_strided_slice %1 {offsets = [0, 0, 0], sizes = [8, 16, 128], strides = [1, 1, 1]} : vector<10x18x128xbf16> to vector<8x16x128xbf16>
    %4 = vector.shape_cast %3 : vector<8x16x128xbf16> to vector<128x128xbf16>
    %c0_4 = arith.constant 0 : index
    %c0_5 = arith.constant 0 : index
    %c0_6 = arith.constant 0 : index
    %5 = vector.load %arg3[%c0_4, %c0_5, %c0_6] : memref<9x128x128xbf16, #tpu.memory_space<vmem>>, vector<1x128x128xbf16>
    %6 = vector.shape_cast %5 : vector<1x128x128xbf16> to vector<128x128xbf16>
    %cst_7 = arith.constant dense<0.000000e+00> : vector<128x128xf32>
    %7 = tpu.matmul %4, %6, %cst_7 {dimension_numbers = #tpu.dot_dimension_numbers<[1], [0], [0], [1], [0, 0, 1, 1], [], []>} : vector<128x128xbf16>, vector<128x128xbf16>, vector<128x128xf32> -> vector<128x128xf32>
    %8 = arith.addf %2, %7 : vector<128x128xf32>
    %9 = vector.extract_strided_slice %1 {offsets = [0, 1, 0], sizes = [8, 16, 128], strides = [1, 1, 1]} : vector<10x18x128xbf16> to vector<8x16x128xbf16>
    %10 = vector.shape_cast %9 : vector<8x16x128xbf16> to vector<128x128xbf16>
    %c1 = arith.constant 1 : index
    %c0_8 = arith.constant 0 : index
    %c0_9 = arith.constant 0 : index
    %11 = vector.load %arg3[%c1, %c0_8, %c0_9] : memref<9x128x128xbf16, #tpu.memory_space<vmem>>, vector<1x128x128xbf16>
    %12 = vector.shape_cast %11 : vector<1x128x128xbf16> to vector<128x128xbf16>
    %cst_10 = arith.constant dense<0.000000e+00> : vector<128x128xf32>
    %13 = tpu.matmul %10, %12, %cst_10 {dimension_numbers = #tpu.dot_dimension_numbers<[1], [0], [0], [1], [0, 0, 1, 1], [], []>} : vector<128x128xbf16>, vector<128x128xbf16>, vector<128x128xf32> -> vector<128x128xf32>
    %14 = arith.addf %8, %13 : vector<128x128xf32>
    %15 = vector.extract_strided_slice %1 {offsets = [0, 2, 0], sizes = [8, 16, 128], strides = [1, 1, 1]} : vector<10x18x128xbf16> to vector<8x16x128xbf16>
    %16 = vector.shape_cast %15 : vector<8x16x128xbf16> to vector<128x128xbf16>
    %c2 = arith.constant 2 : index
    %c0_11 = arith.constant 0 : index
    %c0_12 = arith.constant 0 : index
    %17 = vector.load %arg3[%c2, %c0_11, %c0_12] : memref<9x128x128xbf16, #tpu.memory_space<vmem>>, vector<1x128x128xbf16>
    %18 = vector.shape_cast %17 : vector<1x128x128xbf16> to vector<128x128xbf16>
    %cst_13 = arith.constant dense<0.000000e+00> : vector<128x128xf32>
    %19 = tpu.matmul %16, %18, %cst_13 {dimension_numbers = #tpu.dot_dimension_numbers<[1], [0], [0], [1], [0, 0, 1, 1], [], []>} : vector<128x128xbf16>, vector<128x128xbf16>, vector<128x128xf32> -> vector<128x128xf32>
    %20 = arith.addf %14, %19 : vector<128x128xf32>
    %21 = vector.extract_strided_slice %1 {offsets = [1, 0, 0], sizes = [8, 16, 128], strides = [1, 1, 1]} : vector<10x18x128xbf16> to vector<8x16x128xbf16>
    %22 = vector.shape_cast %21 : vector<8x16x128xbf16> to vector<128x128xbf16>
    %c3 = arith.constant 3 : index
    %c0_14 = arith.constant 0 : index
    %c0_15 = arith.constant 0 : index
    %23 = vector.load %arg3[%c3, %c0_14, %c0_15] : memref<9x128x128xbf16, #tpu.memory_space<vmem>>, vector<1x128x128xbf16>
    %24 = vector.shape_cast %23 : vector<1x128x128xbf16> to vector<128x128xbf16>
    %cst_16 = arith.constant dense<0.000000e+00> : vector<128x128xf32>
    %25 = tpu.matmul %22, %24, %cst_16 {dimension_numbers = #tpu.dot_dimension_numbers<[1], [0], [0], [1], [0, 0, 1, 1], [], []>} : vector<128x128xbf16>, vector<128x128xbf16>, vector<128x128xf32> -> vector<128x128xf32>
    %26 = arith.addf %20, %25 : vector<128x128xf32>
    %27 = vector.extract_strided_slice %1 {offsets = [1, 1, 0], sizes = [8, 16, 128], strides = [1, 1, 1]} : vector<10x18x128xbf16> to vector<8x16x128xbf16>
    %28 = vector.shape_cast %27 : vector<8x16x128xbf16> to vector<128x128xbf16>
    %c4 = arith.constant 4 : index
    %c0_17 = arith.constant 0 : index
    %c0_18 = arith.constant 0 : index
    %29 = vector.load %arg3[%c4, %c0_17, %c0_18] : memref<9x128x128xbf16, #tpu.memory_space<vmem>>, vector<1x128x128xbf16>
    %30 = vector.shape_cast %29 : vector<1x128x128xbf16> to vector<128x128xbf16>
    %cst_19 = arith.constant dense<0.000000e+00> : vector<128x128xf32>
    %31 = tpu.matmul %28, %30, %cst_19 {dimension_numbers = #tpu.dot_dimension_numbers<[1], [0], [0], [1], [0, 0, 1, 1], [], []>} : vector<128x128xbf16>, vector<128x128xbf16>, vector<128x128xf32> -> vector<128x128xf32>
    %32 = arith.addf %26, %31 : vector<128x128xf32>
    %33 = vector.extract_strided_slice %1 {offsets = [1, 2, 0], sizes = [8, 16, 128], strides = [1, 1, 1]} : vector<10x18x128xbf16> to vector<8x16x128xbf16>
    %34 = vector.shape_cast %33 : vector<8x16x128xbf16> to vector<128x128xbf16>
    %c5 = arith.constant 5 : index
    %c0_20 = arith.constant 0 : index
    %c0_21 = arith.constant 0 : index
    %35 = vector.load %arg3[%c5, %c0_20, %c0_21] : memref<9x128x128xbf16, #tpu.memory_space<vmem>>, vector<1x128x128xbf16>
    %36 = vector.shape_cast %35 : vector<1x128x128xbf16> to vector<128x128xbf16>
    %cst_22 = arith.constant dense<0.000000e+00> : vector<128x128xf32>
    %37 = tpu.matmul %34, %36, %cst_22 {dimension_numbers = #tpu.dot_dimension_numbers<[1], [0], [0], [1], [0, 0, 1, 1], [], []>} : vector<128x128xbf16>, vector<128x128xbf16>, vector<128x128xf32> -> vector<128x128xf32>
    %38 = arith.addf %32, %37 : vector<128x128xf32>
    %39 = vector.extract_strided_slice %1 {offsets = [2, 0, 0], sizes = [8, 16, 128], strides = [1, 1, 1]} : vector<10x18x128xbf16> to vector<8x16x128xbf16>
    %40 = vector.shape_cast %39 : vector<8x16x128xbf16> to vector<128x128xbf16>
    %c6 = arith.constant 6 : index
    %c0_23 = arith.constant 0 : index
    %c0_24 = arith.constant 0 : index
    %41 = vector.load %arg3[%c6, %c0_23, %c0_24] : memref<9x128x128xbf16, #tpu.memory_space<vmem>>, vector<1x128x128xbf16>
    %42 = vector.shape_cast %41 : vector<1x128x128xbf16> to vector<128x128xbf16>
    %cst_25 = arith.constant dense<0.000000e+00> : vector<128x128xf32>
    %43 = tpu.matmul %40, %42, %cst_25 {dimension_numbers = #tpu.dot_dimension_numbers<[1], [0], [0], [1], [0, 0, 1, 1], [], []>} : vector<128x128xbf16>, vector<128x128xbf16>, vector<128x128xf32> -> vector<128x128xf32>
    %44 = arith.addf %38, %43 : vector<128x128xf32>
    %45 = vector.extract_strided_slice %1 {offsets = [2, 1, 0], sizes = [8, 16, 128], strides = [1, 1, 1]} : vector<10x18x128xbf16> to vector<8x16x128xbf16>
    %46 = vector.shape_cast %45 : vector<8x16x128xbf16> to vector<128x128xbf16>
    %c7 = arith.constant 7 : index
    %c0_26 = arith.constant 0 : index
    %c0_27 = arith.constant 0 : index
    %47 = vector.load %arg3[%c7, %c0_26, %c0_27] : memref<9x128x128xbf16, #tpu.memory_space<vmem>>, vector<1x128x128xbf16>
    %48 = vector.shape_cast %47 : vector<1x128x128xbf16> to vector<128x128xbf16>
    %cst_28 = arith.constant dense<0.000000e+00> : vector<128x128xf32>
    %49 = tpu.matmul %46, %48, %cst_28 {dimension_numbers = #tpu.dot_dimension_numbers<[1], [0], [0], [1], [0, 0, 1, 1], [], []>} : vector<128x128xbf16>, vector<128x128xbf16>, vector<128x128xf32> -> vector<128x128xf32>
    %50 = arith.addf %44, %49 : vector<128x128xf32>
    %51 = vector.extract_strided_slice %1 {offsets = [2, 2, 0], sizes = [8, 16, 128], strides = [1, 1, 1]} : vector<10x18x128xbf16> to vector<8x16x128xbf16>
    %52 = vector.shape_cast %51 : vector<8x16x128xbf16> to vector<128x128xbf16>
    %c8 = arith.constant 8 : index
    %c0_29 = arith.constant 0 : index
    %c0_30 = arith.constant 0 : index
    %53 = vector.load %arg3[%c8, %c0_29, %c0_30] : memref<9x128x128xbf16, #tpu.memory_space<vmem>>, vector<1x128x128xbf16>
    %54 = vector.shape_cast %53 : vector<1x128x128xbf16> to vector<128x128xbf16>
    %cst_31 = arith.constant dense<0.000000e+00> : vector<128x128xf32>
    %55 = tpu.matmul %52, %54, %cst_31 {dimension_numbers = #tpu.dot_dimension_numbers<[1], [0], [0], [1], [0, 0, 1, 1], [], []>} : vector<128x128xbf16>, vector<128x128xbf16>, vector<128x128xf32> -> vector<128x128xf32>
    %56 = arith.addf %50, %55 : vector<128x128xf32>
    %c0_32 = arith.constant 0 : index
    %c0_33 = arith.constant 0 : index
    %57 = vector.load %arg4[%c0_32, %c0_33] : memref<1x128xf32, #tpu.memory_space<vmem>>, vector<1x128xf32>
    %58 = vector.broadcast %57 : vector<1x128xf32> to vector<128x128xf32>
    %59 = arith.addf %56, %58 : vector<128x128xf32>
    %cst_34 = arith.constant 0.000000e+00 : f32
    %60 = vector.broadcast %cst_34 : f32 to vector<128x128xf32>
    %61 = arith.maximumf %59, %60 : vector<128x128xf32>
    %62 = tpu.transpose %61, [1, 0] : vector<128x128xf32> -> vector<128x128xf32>
    %63 = arith.truncf %62 : vector<128x128xf32> to vector<128x128xbf16>
    %c0_35 = arith.constant 0 : index
    %c0_36 = arith.constant 0 : index
    %64 = vector.load %arg5[%c0_35, %c0_36] : memref<16x128xbf16, #tpu.memory_space<vmem>>, vector<16x128xbf16>
    %cst_37 = arith.constant dense<0.000000e+00> : vector<16x128xf32>
    %65 = tpu.matmul %64, %63, %cst_37 {dimension_numbers = #tpu.dot_dimension_numbers<[1], [0], [0], [1], [0, 0, 1, 1], [], []>} : vector<16x128xbf16>, vector<128x128xbf16>, vector<16x128xf32> -> vector<16x128xf32>
    %c0_38 = arith.constant 0 : index
    %c0_39 = arith.constant 0 : index
    %66 = vector.load %arg6[%c0_38, %c0_39] : memref<16x1xf32, #tpu.memory_space<vmem>>, vector<16x1xf32>
    %67 = vector.broadcast %66 : vector<16x1xf32> to vector<16x128xf32>
    %68 = arith.addf %65, %67 : vector<16x128xf32>
    %c0_40 = arith.constant 0 : index
    %c0_41 = arith.constant 0 : index
    %c0_42 = arith.constant 0 : index
    %69 = vector.load %arg7[%c0_40, %c0_41, %c0_42] : memref<1x16x128xf32, #tpu.memory_space<vmem>>, vector<1x16x128xf32>
    %70 = vector.shape_cast %69 : vector<1x16x128xf32> to vector<16x128xf32>
    %71 = vector.shape_cast %68 : vector<16x128xf32> to vector<1x16x128xf32>
    tpu.vector_store %arg7[%c0_40, %c0_41, %c0_42], %71 {strides = array<i32>} : memref<1x16x128xf32, #tpu.memory_space<vmem>>, vector<1x16x128xf32>,
    return
  }
  func.func @transform_0(%arg0: i32, %arg1: i32) -> (i32, i32, i32, i32, i32) {
    %c0_i32 = arith.constant 0 : i32
    %c0_i32_0 = arith.constant 0 : i32
    %c0_i32_1 = arith.constant 0 : i32
    %c0_i32_2 = arith.constant 0 : i32
    return %arg0, %arg1, %c0_i32, %c0_i32_0, %c0_i32_1 : i32, i32, i32, i32, i32
  }
  func.func @transform_1(%arg0: i32, %arg1: i32) -> (i32, i32, i32) {
    %c0_i32 = arith.constant 0 : i32
    %c0_i32_0 = arith.constant 0 : i32
    %c0_i32_1 = arith.constant 0 : i32
    %c0_i32_2 = arith.constant 0 : i32
    return %c0_i32, %c0_i32_0, %c0_i32_1 : i32, i32, i32
  }
  func.func @transform_2(%arg0: i32, %arg1: i32) -> (i32, i32) {
    %c0_i32 = arith.constant 0 : i32
    %c0_i32_0 = arith.constant 0 : i32
    %c0_i32_1 = arith.constant 0 : i32
    return %c0_i32, %c0_i32_0 : i32, i32
  }
  func.func @transform_3(%arg0: i32, %arg1: i32) -> (i32, i32) {
    %c0_i32 = arith.constant 0 : i32
    %c0_i32_0 = arith.constant 0 : i32
    %c0_i32_1 = arith.constant 0 : i32
    return %c0_i32, %c0_i32_0 : i32, i32
  }
  func.func @transform_4(%arg0: i32, %arg1: i32) -> (i32, i32) {
    %c0_i32 = arith.constant 0 : i32
    %c0_i32_0 = arith.constant 0 : i32
    %c0_i32_1 = arith.constant 0 : i32
    return %c0_i32, %c0_i32_0 : i32, i32
  }
  func.func @transform_5(%arg0: i32, %arg1: i32) -> (i32, i32, i32) {
    %c0_i32 = arith.constant 0 : i32
    %c0_i32_0 = arith.constant 0 : i32
    return %arg0, %c0_i32, %arg1 : i32, i32, i32
  }
}

</mosaic_0001>

<bundles_post_ra>
// kernel: tpu_custom_call.1
= control target key start
LH: loop header
LB: loop body
LE: loop exit
PB: predicated region body
PF: predicated region fallthrough
CT: control target
= control target key end

     0   :  { %10 = vsyncpa [#allocation3], 0  ;;  %s4483_s0 = inlined_call_operand.vmem [shape: bf16[2,2,10,18,128], index: 0, kind: input, shape index: {}]   ;;  %s4484_s1 = inlined_call_operand.vmem [shape: bf16[9,128,128], index: 1, kind: input, shape index: {}]   ;;  %s4485_s2 = inlined_call_operand.vmem [shape: f32[1,128], index: 2, kind: input, shape index: {}]   ;;  %s4486_s3 = inlined_call_operand.vmem [shape: bf16[16,128], index: 3, kind: input, shape index: {}]   ;;  %s4487_s4 = inlined_call_operand.vmem [shape: f32[16,1], index: 4, kind: input, shape index: {}]   ;;  %s4488_s5 = inlined_call_operand.hbm [shape: f32[2,16,256], index: 5, kind: output, shape index: {}]  }
   0x1   :  { %12 = vsyncpa [#allocation3 + $0x1], 0  ;;  %s3698_s18 = smov 0   ;;  %s3700_s19 = smov 0  }
   0x2   :  { %s3702_s20 = smov 0   ;;  %s3704_s21 = smov 0  }
   0x3   :  { %s3706_s22 = smov 0   ;;  %s3708_s23 = smov 0  }
   0x4   :  { %s3710_s24 = smov 0   ;;  %s3712_s25 = smov 0  }
   0x5 LB: > { %s2558_s26 = sadd.s32 4294967295, %s3659_s25   ;;  %s2559_s27 = sadd.s32 4294967294, %s3659_s25   ;;  %s3659_s25 = sphi %s3712_s25, %s18_s25   ;;  %s3655_s24 = sphi %s3710_s24, %s4504_s24   ;;  %s3651_s23 = sphi %s3708_s23, %s4503_s23   ;;  %s3647_s22 = sphi %s3706_s22, %s4502_s22   ;;  %s3643_s21 = sphi %s3704_s21, %s4501_s21   ;;  %s3639_s20 = sphi %s3702_s20, %s4500_s20   ;;  %s3635_s19 = sphi %s3700_s19, %s4499_s19   ;;  %s3631_s18 = sphi %s3698_s18, %s4498_s18  }
   0x6   : > { %s27_s28 = sadd.s32 1, %s3651_s23  ;;  %s30_s29 = sadd.s32 1, %s3655_s24 }
   0x7   : > { %p28_p0 = scmp.ge.s32.totalorder %s27_s28, 2  ;;  %p161_p1 = scmp.ne.s32.totalorder %s3639_s20, %s3635_s19 }
   0x8   : > { %p162_p2 = scmp.eq.s32.totalorder %s2558_s26, 3  ;;  %p167_p5 = scmp.ne.s32.totalorder %s3635_s19, %s3631_s18 }
   0x9   : > { %s4506_s28 = smov (%p28_p0, %s27_s28), 0  ;;  %s4508_s29 = smov (!%p28_p0, %s30_s29), %s3655_s24 }
   0xa   : > { %s147_s30 = ssub.s32 %s3651_s23, %s4506_s28  ;;  %p3749_p3 = por %p162_p2, %p161_p1 }
   0xb   : > { %p32_p4 = scmp.ge.s32.totalorder %s4508_s29, 2  ;;  %p168_p6 = scmp.eq.s32.totalorder %s2559_s27, 3 }
   0xc   : > { %p2562_p7 = scmp.ge.s32.totalorder %s3659_s25, 1  ;;  %p210_p9 = scmp.lt.s32.totalorder %s3659_s25, 5 }
   0xd   : > { %s4510_s29 = smov (%p32_p4, %s4508_s29), 0  ;;  %p3758_p8 = por %p168_p6, %p167_p5 }
   0xe   : > { %4491 = sst [smem:[#allocation5_spill]] %s4510_s29  ;;  %s146_s8 = ssub.s32 %s3655_s24, %s4510_s29 }
   0xf   : > { %s151_s9 = sadd.s32 1, %s3639_s20  ;;  %s148_s10 = sor.u32 %s147_s30, %s146_s8 }
  0x10   : > { %p211_p10 = pnand %p2562_p7, %p210_p9  ;;  %p149_p11 = scmp.eq.s32.totalorder %s148_s10, 0 }
  0x11   : > { %v3482_v0 = vld [vmem:[%s4484_s1 + $0x40] sm:$0xff] (!%p211_p10)   ;;  %p242_p12 = scmp.lt.s32.totalorder (!%p211_p10), %s3647_s22, 1  ;;  %p244_p13 = scmp.lt.s32.totalorder (!%p211_p10), %s3643_s21, 1  ;;  %v3484_v2 = vld [vmem:[%s4484_s1 + $0x48] sm:$0xff] (!%p211_p10)   ;;  %v3486_v4 = vld [vmem:[%s4484_s1 + $0x50] sm:$0xff] (!%p211_p10)   ;;  %vm888_vm3 = vcmask (!%p211_p10), 1042432  }
  0x12   : > { %s3767_s11 = scalar_select %p149_p11, %s3639_s20, %s151_s9  }
  0x13   : > { %214 = sbr.rel (%p211_p10) target bundleno = 829 (0x33d), region = 40  ;;  %v3483_v1 = vld [vmem:[%s4484_s1 + $0x100] sm:$0xff] (!%p211_p10)   ;;  %2965 = vmatprep.subr.bf16.mxu1 (!%p211_p10), %v3482_v0  ;;  %v3485_v3 = vld [vmem:[%s4484_s1 + $0x108] sm:$0xff] (!%p211_p10)   ;;  %v3487_v5 = vld [vmem:[%s4484_s1 + $0x110] sm:$0xff] (!%p211_p10)   ;;  %vm298_vm0 = vsmask.f32 (!%p211_p10), 3328 }
  0x14   : > { %3093 = vmatprep.subr.bf16.mxu0 (!%p211_p10), %v3483_v1  ;;  %2966 = vmatpush3.bf16.msra.mxu1 (!%p211_p10), %v3482_v0  ;;  %v3488_v6 = vld [vmem:[%s4484_s1 + $0x58] sm:$0xff] (!%p211_p10)   ;;  %v3490_v8 = vld [vmem:[%s4484_s1 + $0x60] sm:$0xff] (!%p211_p10)   ;;  %v3492_v10 = vld [vmem:[%s4484_s1 + $0x68] sm:$0xff] (!%p211_p10)   ;;  %vm299_vm1 = vsmask.f32 (!%p211_p10), 7440  ;;  %vm889_vm4 = vcmask (!%p211_p10), 1046532  }
  0x15   : > { %3094 = vmatpush3.bf16.msra.mxu0 (!%p211_p10), %v3483_v1  ;;  %2967 = vmatprep.subr.bf16.mxu1 (!%p211_p10), %v3484_v2  ;;  %v3489_v7 = vld [vmem:[%s4484_s1 + $0x118] sm:$0xff] (!%p211_p10)   ;;  %v3491_v9 = vld [vmem:[%s4484_s1 + $0x120] sm:$0xff] (!%p211_p10)   ;;  %v3493_v11 = vld [vmem:[%s4484_s1 + $0x128] sm:$0xff] (!%p211_p10)   ;;  %vm3662_vm6 = vmmov (!%p211_p10), 0   ;;  %s239_s13 = sand.u32 (!%p211_p10), 1, %s3635_s19   ;;  %s2808_s29 = sshll.u32 (!%p211_p10), %s3647_s22, 2 }
  0x16   : > { %3095 = vmatprep.subr.bf16.mxu0 (!%p211_p10), %v3485_v3  ;;  %v3494_v17 = vld [vmem:[%s4484_s1 + $0x70] sm:$0xff] (!%p211_p10)   ;;  %v3496_v35 = vld [vmem:[%s4484_s1 + $0x78] sm:$0xff] (!%p211_p10)   ;;  %vm3852_vm2 = vmor (!%p211_p10), %vm298_vm0, %vm299_vm1  ;;  %s2563_s14 = sshll.u32 (!%p211_p10), %s239_s13, 4  ;;  %s2471_s17 = sadd.s32 (!%p211_p10), %s3643_s21, %s2808_s29 }
  0x17   : > { %v3495_v30 = vld [vmem:[%s4484_s1 + $0x130] sm:$0xff] (!%p211_p10)   ;;  %v3497_v51 = vld [vmem:[%s4484_s1 + $0x138] sm:$0xff] (!%p211_p10)   ;;  %v3498_v0 = vld [vmem:[%s4484_s1] sm:$0xff] (!%p211_p10)   ;;  %s2809_s30 = sshll.u32 (!%p211_p10), %s2471_s17, 7 }
  0x18   : > { %2968 = vmatpush3.bf16.msra.mxu1 (!%p211_p10), %v3484_v2  ;;  %vm4053_vm5 = vmor (!%p211_p10), %vm888_vm3, %vm889_vm4 }
  0x19   : > { %3096 = vmatpush3.bf16.msra.mxu0 (!%p211_p10), %v3485_v3  ;;  %2969 = vmatprep.subr.bf16.mxu1 (!%p211_p10), %v3486_v4 }
  0x1a   : > { %s243_s26 = scalar_select %p242_p12, %s3647_s22, 1  ;;  %3097 = vmatprep.subr.bf16.mxu0 %v3487_v5 }
  0x1b   : > { %s245_s8 = scalar_select %p244_p13, %s3643_s21, 1 }
  0x1c   : > { %s3402_s12 = smul.u32 60, %s243_s26  ;;  %2970 = vmatpush3.bf16.msra.mxu1 %v3486_v4  ;;  %v3499_v4 = vld [vmem:[%s4484_s1 + $0x140] sm:$0xff]   ;;  %s4429_s22 = scalar_lea.hbm %s4488_s5, %s2809_s30 }
  0x1d   : > { %s3401_s15 = smul.u32 30, %s245_s8  ;;  %3098 = vmatpush3.bf16.msra.mxu0 %v3487_v5  ;;  %2971 = vmatprep.subr.bf16.mxu1 %v3488_v6  ;;  %s4431_s21 = scalar_lea.sflag [#allocation3], %s239_s13 }
  0x1e   : > { %3099 = vmatprep.subr.bf16.mxu0 %v3489_v7  ;;  %s3664_s8 = smov [#allocation2]  }
  0x1f   : > { %s248_s16 = sadd.s32 %s3402_s12, %s3401_s15  ;;  %s3569_s12 = sshll.u32 %s3664_s8, 4  ;;  %s3570_s12 = int_to_ptr.vmem [resolvable:$false] %s3569_s12 }
  0x20   : > { %s2564_s26 = sshll.u32 %s248_s16, 2  ;;  %2972 = vmatpush3.bf16.msra.mxu1 %v3488_v6  ;;  %s241_s16 = scalar_lea.vmem [#allocation2], %s2563_s14 }
  0x21   : > { %s3806_s15 = scalar_lea.vmem %s4483_s0, %s2564_s26  ;;  %3100 = vmatpush3.bf16.msra.mxu0 %v3489_v7  ;;  %2973 = vmatprep.subr.bf16.mxu1 %v3490_v8  ;;  %s2474_s27 = sshll.u32 %s241_s16, 4  ;;  %s4424_s27 = int_to_ptr.vmem [resolvable:$true] %s2474_s27 }
  0x22   : > { %v3815_v12 = vld [vmem:[%s3806_s15] sm:$0xf]  ;;  %v3818_v13 = vld [vmem:[%s3806_s15 + $0x4] sm:$0xf]  ;;  %v3821_v14 = vld [vmem:[%s3806_s15 + $0x8] sm:$0x1]  ;;  %3101 = vmatprep.subr.bf16.mxu0 %v3491_v9  ;;  %p3572_p4 = scmp.lt.s32.totalorder %s4424_s27, %s3570_s12 }
  0x23   : > { %v302_v15 = vshrl.u32 %v3815_v12, 16  ;;  %v305_v16 = vshll.u32 %v3815_v12, 16  ;;  %v311_v18 = vshll.u32 %v3818_v13, 16  ;;  %v315_v19 = vshrl.u32 %v3818_v13, 16  ;;  %v3832_v21 = vld [vmem:[%s3806_s15 + $0xc] sm:$0xf] }
  0x24   : > { %v321_v20 = vshll.u32 %v3821_v14, 16  ;;  %2974 = vmatpush3.bf16.msra.mxu1 %v3490_v8  ;;  %v3835_v24 = vld [vmem:[%s3806_s15 + $0x10] sm:$0xf]  ;;  %v3838_v25 = vld [vmem:[%s3806_s15 + $0x14] sm:$0x1]  ;;  %v326_v29 = vshrl.u32 %v3832_v21, 16 }
  0x25   : > { %v304_v22 = vrot.slane %v302_v15, 4  ;;  %v307_v23 = vrot.slane %v305_v16, 5  ;;  %3102 = vmatpush3.bf16.msra.mxu0 %v3491_v9  ;;  %2975 = vmatprep.subr.bf16.mxu1 %v3492_v10  ;;  %v313_v26 = vrot.slane %v311_v18, 5  ;;  %v317_v27 = vrot.slane %v315_v19, 4  ;;  %v3858_v40 = vld [vmem:[%s3806_s15 + $0x18] sm:$0xf] }
  0x26   : > { %v323_v28 = vrot.slane %v321_v20, 5  ;;  %3103 = vmatprep.subr.bf16.mxu0 %v3493_v11  ;;  %v329_v32 = vshll.u32 %v3832_v21, 16  ;;  %v335_v33 = vshll.u32 %v3835_v24, 16  ;;  %v339_v34 = vshrl.u32 %v3835_v24, 16  ;;  %v3861_v41 = vld [vmem:[%s3806_s15 + $0x1c] sm:$0xf] }
  0x27   : > { %v308_v31 = vor.u32 %v307_v23, %v304_v22  ;;  %v318_v37 = vor.u32 %v317_v27, %v313_v26  ;;  %v328_v38 = vrot.slane %v326_v29, 4  ;;  %v345_v39 = vshll.u32 %v3838_v25, 16  ;;  %v3864_v46 = vld [vmem:[%s3806_s15 + $0x20] sm:$0x1]  ;;  %v3889_v7 = vld [vmem:[%s3806_s15 + $0x24] sm:$0xf] }
  0x28   : > { %2976 = vmatpush3.bf16.msra.mxu1 %v3492_v10  ;;  %v331_v43 = vrot.slane %v329_v32, 5  ;;  %v337_v44 = vrot.slane %v335_v33, 5  ;;  %v341_v45 = vrot.slane %v339_v34, 4  ;;  %v350_v49 = vshrl.u32 %v3858_v40, 16  ;;  %v3892_v8 = vld [vmem:[%s3806_s15 + $0x28] sm:$0xf] }
  0x29   : > { %v309_v42 = vrot.slane %v308_v31, 4  ;;  %3104 = vmatpush3.bf16.msra.mxu0 %v3493_v11  ;;  %2977 = vmatprep.subr.bf16.mxu1 %v3494_v17  ;;  %v319_v47 = vrot.slane %v318_v37, 4  ;;  %v347_v48 = vrot.slane %v345_v39, 5  ;;  %v353_v50 = vshll.u32 %v3858_v40, 16  ;;  %v3895_v9 = vld [vmem:[%s3806_s15 + $0x2c] sm:$0x1] }
  0x2a   : > { %3105 = vmatprep.subr.bf16.mxu0 %v3495_v30  ;;  %v332_v53 = vor.u32 %v331_v43, %v328_v38  ;;  %v342_v54 = vor.u32 %v341_v45, %v337_v44  ;;  %v359_v55 = vshll.u32 %v3861_v41, 16  ;;  %v352_v57 = vrot.slane %v350_v49, 4  ;;  %v3905_v23 = vld [vmem:[%s3806_s15 + $0x30] sm:$0xf]  ;;  %v3911_v29 = vld [vmem:[%s3806_s15 + $0x34] sm:$0xf] }
  0x2b   : > { %v314_v52 = vsel %vm3852_vm2, %v309_v42, %v313_v26  ;;  %v324_v56 = vsel %vm3852_vm2, %v319_v47, %v323_v28  ;;  %v355_v58 = vrot.slane %v353_v50, 5  ;;  %v363_v59 = vshrl.u32 %v3861_v41, 16  ;;  %v3501_v37 = vld [vmem:[%s4484_s1 + $0x148] sm:$0xff]   ;;  %v3502_v47 = vld [vmem:[%s4484_s1 + $0x10] sm:$0xff]   ;;  %s3565_s10 = scalar_lea.vmem %s4424_s27, 256 }
  0x2c   : > { %2978 = vmatpush3.bf16.msra.mxu1 %v3494_v17  ;;  %v2581_v60 = vcombine.low %v314_v52, %v324_v56  ;;  %v333_v61 = vrot.slane %v332_v53, 4  ;;  %v343_v62 = vrot.slane %v342_v54, 4  ;;  %v361_v63 = vrot.slane %v359_v55, 5  ;;  %v3500_v17 = vld [vmem:[%s4484_s1 + $0x8] sm:$0xff]   ;;  %v3503_v56 = vld [vmem:[%s4484_s1 + $0x150] sm:$0xff]   ;;  %p3566_p0 = scmp.ne.s32.totalorder %s4424_s27, %s3565_s10 }
  0x2d   : > { %3106 = vmatpush3.bf16.msra.mxu0 %v3495_v30  ;;  %2979 = vmatprep.subr.bf16.mxu1 %v3496_v35  ;;  %v356_v1 = vor.u32 %v355_v58, %v352_v57  ;;  %v365_v2 = vrot.slane %v363_v59, 4  ;;  %v369_v3 = vshll.u32 %v3864_v46, 16  ;;  %v374_v18 = vshrl.u32 %v3889_v7, 16  ;;  %v3914_v30 = vld [vmem:[%s3806_s15 + $0x38] sm:$0x1] }
  0x2e   : > { %3107 = vmatprep.subr.bf16.mxu0 %v3497_v51  ;;  %2981 = vmatprep.mubr.bf16.mxu1 %v2581_v60  ;;  %v338_v5 = vsel %vm3852_vm2, %v333_v61, %v337_v44  ;;  %v348_v6 = vsel %vm3852_vm2, %v343_v62, %v347_v48  ;;  %v377_v19 = vshll.u32 %v3889_v7, 16  ;;  %v383_v20 = vshll.u32 %v3892_v8, 16  ;;  %v3937_v60 = vld [vmem:[%s3806_s15 + $0x3c] sm:$0xf]  ;;  %v3940_v61 = vld [vmem:[%s3806_s15 + $0x40] sm:$0xf]  ;;  %p3567_p1 = pnand %p3566_p0, %p3749_p3 }
  0x2f   : > { %v2582_v10 = vcombine.low %v338_v5, %v348_v6  ;;  %v357_v11 = vrot.slane %v356_v1, 4  ;;  %v366_v15 = vor.u32 %v365_v2, %v361_v63  ;;  %v371_v16 = vrot.slane %v369_v3, 5  ;;  %v3504_v6 = vld [vmem:[%s4484_s1 + $0x18] sm:$0xff]  }
  0x30   : > { %2980 = vmatpush3.bf16.msra.mxu1 %v3496_v35  ;;  %v387_v22 = vshrl.u32 %v3892_v8, 16  ;;  %v393_v28 = vshll.u32 %v3895_v9, 16  ;;  %v376_v31 = vrot.slane %v374_v18, 4  ;;  %v379_v32 = vrot.slane %v377_v19, 5  ;;  %v3960_v18 = vld [vmem:[%s3806_s15 + $0x48] sm:$0xf]  ;;  %p3568_p2 = pneg %p3567_p1 }
  0x31   : > { %3108 = vmatpush3.bf16.msra.mxu0 %v3497_v51  ;;  %3109 = vmatprep.mubr.bf16.mxu0 %v2582_v10  ;;  %v362_v26 = vsel %vm3852_vm2, %v357_v11, %v361_v63  ;;  %v367_v27 = vrot.slane %v366_v15, 4  ;;  %v385_v33 = vrot.slane %v383_v20, 5  ;;  %v398_v39 = vshrl.u32 %v3905_v23, 16 }
  0x32   : > { %2997 = vmatprep.subr.bf16.mxu1 %v3498_v0  ;;  %3125 = vmatprep.subr.bf16.mxu0 %v3499_v4  ;;  %v389_v34 = vrot.slane %v387_v22, 4  ;;  %v395_v38 = vrot.slane %v393_v28, 5  ;;  %v401_v42 = vshll.u32 %v3905_v23, 16  ;;  %v380_v44 = vor.u32 %v379_v32, %v376_v31  ;;  %v3505_v28 = vld [vmem:[%s4484_s1 + $0x158] sm:$0xff]  }
  0x33   : > { %2982 = vmatmul.mubr.bf16.vlgmr.msra.gmra.mrb[0].mxu1 %v2582_v10  ;;  %v372_v35 = vsel %vm3852_vm2, %v367_v27, %v371_v16  ;;  %v407_v48 = vshll.u32 %v3911_v29, 16  ;;  %v400_v49 = vrot.slane %v398_v39, 4  ;;  %v411_v51 = vshrl.u32 %v3911_v29, 16  ;;  %v3969_v27 = vld [vmem:[%s3806_s15 + $0x50] sm:$0x1] }
  0x34   : > { %v3923_v43 = vcombine.low %v362_v26, %v372_v35  ;;  %2998 = vmatpush3.bf16.msra.mxu1 %v3498_v0  ;;  %v390_v45 = vor.u32 %v389_v34, %v385_v33  ;;  %v403_v50 = vrot.slane %v401_v42, 5  ;;  %v417_v52 = vshll.u32 %v3914_v30, 16  ;;  %v3947_v0 = vld [vmem:[%s3806_s15 + $0x44] sm:$0x1]  ;;  %v3966_v26 = vld [vmem:[%s3806_s15 + $0x4c] sm:$0xf] }
  0x35   : > { %2999 = vmatprep.subr.bf16.mxu1 %v3500_v17  ;;  %v381_v53 = vrot.slane %v380_v44, 4  ;;  %v409_v55 = vrot.slane %v407_v48, 5  ;;  %v413_v58 = vrot.slane %v411_v51, 4  ;;  %v422_v1 = vshrl.u32 %v3937_v60, 16 }
  0x36   : > { %3110 = vmatmul.mubr.bf16.vlgmr.msra.gmra.mrb[0].mxu0 %v3923_v43  ;;  %2985 = vmatprep.mubr.bf16.mxu1 %v3923_v43  ;;  %v391_v54 = vrot.slane %v390_v45, 4  ;;  %v404_v57 = vor.u32 %v403_v50, %v400_v49  ;;  %v419_v59 = vrot.slane %v417_v52, 5  ;;  %v425_v2 = vshll.u32 %v3937_v60, 16 }
  0x37   : > { %3126 = vmatpush3.bf16.msra.mxu0 %v3499_v4  ;;  %v386_v62 = vsel %vm3852_vm2, %v381_v53, %v385_v33  ;;  %v414_v5 = vor.u32 %v413_v58, %v409_v55  ;;  %v431_v10 = vshll.u32 %v3940_v61, 16  ;;  %v424_v11 = vrot.slane %v422_v1, 4 }
  0x38   : > { %3127 = vmatprep.subr.bf16.mxu0 %v3501_v37  ;;  %3000 = vmatpush3.bf16.msra.mxu1 %v3500_v17  ;;  %v396_v63 = vsel %vm3852_vm2, %v391_v54, %v395_v38  ;;  %v405_v4 = vrot.slane %v404_v57, 4  ;;  %v427_v15 = vrot.slane %v425_v2, 5  ;;  %v435_v16 = vshrl.u32 %v3940_v61, 16  ;;  %v3994_v57 = vld [vmem:[%s3806_s15 + $0x54] sm:$0xf] }
  0x39   : > { %v3951_v3 = vcombine.low %v386_v62, %v396_v63  ;;  %3001 = vmatprep.subr.bf16.mxu1 %v3502_v47  ;;  %v441_v17 = vshll.u32 %v3947_v0, 16  ;;  %v415_v20 = vrot.slane %v414_v5, 4  ;;  %v433_v22 = vrot.slane %v431_v10, 5  ;;  %v3998_v62 = vld [vmem:[%s3806_s15 + $0x58] sm:$0xf] }
  0x3a   : > { %v410_v19 = vsel %vm3852_vm2, %v405_v4, %v409_v55  ;;  %v428_v31 = vor.u32 %v427_v15, %v424_v11  ;;  %v437_v32 = vrot.slane %v435_v16, 4  ;;  %v446_v34 = vshrl.u32 %v3960_v18, 16  ;;  %v3507_v55 = vld [vmem:[%s4484_s1 + $0x160] sm:$0xff]   ;;  %v4001_v63 = vld [vmem:[%s3806_s15 + $0x5c] sm:$0x1]  ;;  %v3508_v4 = vld [vmem:[%s4484_s1 + $0x28] sm:$0xff]  }
  0x3b   : > { %3128 = vmatpush3.bf16.msra.mxu0 %v3501_v37  ;;  %3113 = vmatprep.mubr.bf16.mxu0 %v3951_v3  ;;  %v443_v33 = vrot.slane %v441_v17, 5  ;;  %v420_v35 = vsel %vm3852_vm2, %v415_v20, %v419_v59  ;;  %v3506_v37 = vld [vmem:[%s4484_s1 + $0x20] sm:$0xff]   ;;  %v449_v38 = vshll.u32 %v3960_v18, 16  ;;  %v455_v39 = vshll.u32 %v3966_v26, 16  ;;  %v3509_v17 = vld [vmem:[%s4484_s1 + $0x168] sm:$0xff]  }
  0x3c   : > { %2986 = vmatmul.mubr.bf16.gmra.mrb[4].mxu1 %v3951_v3  ;;  %3129 = vmatprep.subr.bf16.mxu0 %v3503_v56  ;;  %v459_v42 = vshrl.u32 %v3966_v26, 16  ;;  %v3984_v44 = vcombine.low %v410_v19, %v420_v35  ;;  %v429_v45 = vrot.slane %v428_v31, 4  ;;  %v438_v48 = vor.u32 %v437_v32, %v433_v22  ;;  %v3510_v35 = vld [vmem:[%s4484_s1 + $0x30] sm:$0xff]  }
  0x3d   : > { %3002 = vmatpush3.bf16.msra.mxu1 %v3502_v47  ;;  %v448_v49 = vrot.slane %v446_v34, 4  ;;  %v451_v47 = vrot.slane %v449_v38, 5  ;;  %v457_v50 = vrot.slane %v455_v39, 5  ;;  %v465_v52 = vshll.u32 %v3969_v27, 16  ;;  %v4031_v38 = vld [vmem:[%s3806_s15 + $0x64] sm:$0xf] }
  0x3e   : > { %3003 = vmatprep.subr.bf16.mxu1 %v3504_v6  ;;  %v461_v51 = vrot.slane %v459_v42, 4  ;;  %3114 = vmatmul.mubr.bf16.gmra.mrb[4].mxu0 %v3984_v44  ;;  %v434_v53 = vsel %vm3852_vm2, %v429_v45, %v433_v22  ;;  %v439_v54 = vrot.slane %v438_v48, 4  ;;  %v470_v1 = vshrl.u32 %v3994_v57, 16  ;;  %v4034_v39 = vld [vmem:[%s3806_s15 + $0x68] sm:$0x1] }
  0x3f   : > { %3130 = vmatpush3.bf16.msra.mxu0 %v3503_v56  ;;  %2989 = vmatprep.mubr.bf16.mxu1 %v3984_v44  ;;  %v452_v56 = vor.u32 %v451_v47, %v448_v49  ;;  %v467_v59 = vrot.slane %v465_v52, 5  ;;  %v473_v5 = vshll.u32 %v3994_v57, 16  ;;  %v483_v10 = vshrl.u32 %v3998_v62, 16 }
  0x40   : > { %3131 = vmatprep.subr.bf16.mxu0 %v3505_v28  ;;  %v462_v58 = vor.u32 %v461_v51, %v457_v50  ;;  %v444_v2 = vsel %vm3852_vm2, %v439_v54, %v443_v33  ;;  %v472_v19 = vrot.slane %v470_v1, 4  ;;  %v489_v32 = vshll.u32 %v4001_v63, 16  ;;  %v4019_v33 = vld [vmem:[%s3806_s15 + $0x60] sm:$0xf]  ;;  %v3511_v51 = vld [vmem:[%s4484_s1 + $0x170] sm:$0xff]  }
  0x41   : > { %3004 = vmatpush3.bf16.msra.mxu1 %v3504_v6  ;;  %v479_v6 = vshll.u32 %v3998_v62, 16  ;;  %v4012_v11 = vcombine.low %v434_v53, %v444_v2  ;;  %v453_v15 = vrot.slane %v452_v56, 4  ;;  %v475_v20 = vrot.slane %v473_v5, 5 }
  0x42   : > { %3005 = vmatprep.subr.bf16.mxu1 %v3506_v37  ;;  %v463_v16 = vrot.slane %v462_v58, 4  ;;  %v485_v31 = vrot.slane %v483_v10, 4  ;;  %v1342_v42 = vshrl.u32 %v4019_v33, 16  ;;  %v1345_v45 = vshll.u32 %v4019_v33, 16 }
  0x43   : > { %3132 = vmatpush3.bf16.msra.mxu0 %v3505_v28  ;;  %v481_v22 = vrot.slane %v479_v6, 5  ;;  %3117 = vmatprep.mubr.bf16.mxu0 %v4012_v11  ;;  %v458_v28 = vsel %vm3852_vm2, %v453_v15, %v457_v50  ;;  %v476_v49 = vor.u32 %v475_v20, %v472_v19  ;;  %v491_v50 = vrot.slane %v489_v32, 5 }
  0x44   : > { %3133 = vmatprep.subr.bf16.mxu0 %v3507_v55  ;;  %2990 = vmatmul.mubr.bf16.gmra.mrb[8].mxu1 %v4012_v11  ;;  %v468_v34 = vsel %vm3852_vm2, %v463_v16, %v467_v59  ;;  %v1344_v52 = vrot.slane %v1342_v42, 4  ;;  %v1347_v53 = vrot.slane %v1345_v45, 5  ;;  %v1351_v54 = vshll.u32 %v4031_v38, 16 }
  0x45   : > { %v4038_v48 = vcombine.low %v458_v28, %v468_v34  ;;  %3006 = vmatpush3.bf16.msra.mxu1 %v3506_v37  ;;  %v486_v47 = vor.u32 %v485_v31, %v481_v22  ;;  %v1355_v56 = vshrl.u32 %v4031_v38, 16  ;;  %v477_v58 = vrot.slane %v476_v49, 4  ;;  %v3512_v34 = vld [vmem:[%s4484_s1 + $0x38] sm:$0xff]  }
  0x46   : > { %3007 = vmatprep.subr.bf16.mxu1 %v3508_v4  ;;  %v1361_v59 = vshll.u32 %v4034_v39, 16  ;;  %v2614_v1 = vrot.slane %v3832_v21, 9  ;;  %v1348_v2 = vor.u32 %v1347_v53, %v1344_v52  ;;  %v2597_v6 = vcombine.low %v3815_v12, %v3818_v13 }
  0x47   : > { %3134 = vmatpush3.bf16.msra.mxu0 %v3507_v55  ;;  %v487_v37 = vrot.slane %v486_v47, 4  ;;  %2993 = vmatprep.mubr.bf16.mxu1 %v4038_v48  ;;  %v1353_v55 = vrot.slane %v1351_v54, 5  ;;  %v1357_v5 = vrot.slane %v1355_v56, 4  ;;  %v482_v15 = vsel %vm3852_vm2, %v477_v58, %v481_v22  ;;  %v3513_v22 = vld [vmem:[%s4484_s1 + $0x178] sm:$0xff]  }
  0x48   : > { %3118 = vmatmul.mubr.bf16.gmra.mrb[8].mxu0 %v4038_v48  ;;  %3135 = vmatprep.subr.bf16.mxu0 %v3509_v17  ;;  %v1363_v19 = vrot.slane %v1361_v59, 5  ;;  %v900_v20 = vrot.slane %v3835_v24, 5  ;;  %v1349_v32 = vrot.slane %v1348_v2, 4  ;;  %v907_v45 = vrot.slane %v3861_v41, 5 }
  0x49   : > { %3008 = vmatpush3.bf16.msra.mxu1 %v3508_v4  ;;  %v492_v16 = vsel %vm3852_vm2, %v487_v37, %v491_v50  ;;  %v1358_v28 = vor.u32 %v1357_v5, %v1353_v55  ;;  %v903_v4 = vrot.slane %v3838_v25, 5  ;;  %v4080_v25 = vcombine.low %v4019_v33, %v4031_v38 }
  0x4a   : > { %v4062_v31 = vcombine.low %v482_v15, %v492_v16  ;;  %3009 = vmatprep.subr.bf16.mxu1 %v3510_v35  ;;  %v901_v42 = vsel %vm4053_vm5, %v2614_v1, %v900_v20  ;;  %v1354_v49 = vsel %vm3852_vm2, %v1349_v32, %v1353_v55  ;;  %v910_v50 = vrot.slane %v3864_v46, 5  ;;  %v3516_v46 = vld [vmem:[%s4484_s1 + $0x80] sm:$0xff]  }
  0x4b   : > { %3136 = vmatpush3.bf16.msra.mxu0 %v3509_v17  ;;  %v902_v17 = vrot.slane %v900_v20, 4  ;;  %v1359_v47 = vrot.slane %v1358_v28, 4  ;;  %v2615_v53 = vrot.slane %v3858_v40, 9  ;;  %v909_v58 = vrot.slane %v907_v45, 4 }
  0x4c   : > { %3137 = vmatprep.subr.bf16.mxu0 %v3511_v51  ;;  %3121 = vmatprep.mubr.bf16.mxu0 %v4062_v31  ;;  %v914_v37 = vrot.slane %v3892_v8, 5  ;;  %v2616_v1 = vrot.slane %v3889_v7, 9  ;;  %v4103_v2 = vcombine.low %v3832_v21, %v3835_v24  ;;  %v4108_v5 = vcombine.low %v3858_v40, %v3861_v41  ;;  %v3518_v21 = vld [vmem:[%s4484_s1 + $0x88] sm:$0xff]  }
  0x4d   : > { %2994 = vmatmul.mubr.bf16.gmra.mrb[12].mxu1 %v4062_v31  ;;  %v904_v52 = vsel %vm4053_vm5, %v902_v17, %v903_v4  ;;  %v1364_v54 = vsel %vm3852_vm2, %v1359_v47, %v1363_v19  ;;  %v921_v24 = vrot.slane %v3911_v29, 5  ;;  %v928_v15 = vrot.slane %v3940_v61, 5  ;;  %v3519_v19 = vld [vmem:[%s4484_s1 + $0x188] sm:$0xff]   ;;  %v3522_v4 = vld [vmem:[%s4484_s1 + $0x90] sm:$0xff]  }
  0x4e   : > { %3010 = vmatpush3.bf16.msra.mxu1 %v3510_v35  ;;  %3013 = vmatprep.mubr.bf16.mxu1 %v2597_v6  ;;  %v4088_v56 = vcombine.low %v901_v42, %v904_v52  ;;  %v4091_v59 = vcombine.low %v1354_v49, %v1364_v54  ;;  %v3517_v35 = vld [vmem:[%s4484_s1 + $0x180] sm:$0xff]   ;;  %v916_v55 = vrot.slane %v914_v37, 4  ;;  %v908_v6 = vsel %vm4053_vm5, %v2615_v53, %v907_v45 }
  0x4f   : > { %3138 = vmatpush3.bf16.msra.mxu0 %v3511_v51  ;;  %3011 = vmatprep.subr.bf16.mxu1 %v3512_v34  ;;  %v917_v51 = vrot.slane %v3895_v9, 5  ;;  %v911_v9 = vsel %vm4053_vm5, %v909_v58, %v910_v50  ;;  %v915_v40 = vsel %vm4053_vm5, %v2616_v1, %v914_v37  ;;  %v2617_v20 = vrot.slane %v3905_v23, 9  ;;  %v3525_v37 = vld [vmem:[%s4484_s1 + $0x198] sm:$0xff]  }
  0x50   : > { %3139 = vmatprep.subr.bf16.mxu0 %v3513_v22  ;;  %3122 = vmatmul.mubr.bf16.gmra.mrb[12].mxu0 %v4091_v59  ;;  %v4125_v16 = vcombine.low %v908_v6, %v911_v9  ;;  %v923_v28 = vrot.slane %v921_v24, 4  ;;  %v930_v42 = vrot.slane %v928_v15, 4  ;;  %v931_v17 = vrot.slane %v3947_v0, 5  ;;  %v3524_v0 = vld [vmem:[%s4484_s1 + $0x98] sm:$0xff]  }
  0x51   : > { %3141 = vmatprep.mubr.bf16.mxu0 %v4088_v56  ;;  %v918_v41 = vsel %vm4053_vm5, %v916_v55, %v917_v51  ;;  %v4142_v45 = vcombine.low %v3889_v7, %v3892_v8  ;;  %v4150_v49 = vcombine.low %v3905_v23, %v3911_v29  ;;  %v935_v47 = vrot.slane %v3966_v26, 5 }
  0x52   : > { %3012 = vmatpush3.bf16.msra.mxu1 %v3512_v34  ;;  %v4132_v32 = vcombine.low %v915_v40, %v918_v41  ;;  %v924_v34 = vrot.slane %v3914_v30, 5  ;;  %v3523_v30 = vld [vmem:[%s4484_s1 + $0x190] sm:$0xff]   ;;  %v896_v50 = vrot.slane %v3821_v14, 5  ;;  %v922_v7 = vsel %vm4053_vm5, %v2617_v20, %v921_v24 }
  0x53   : > { %3140 = vmatpush3.bf16.msra.mxu0 %v3513_v22  ;;  %3029 = vmatprep.subr.bf16.mxu1 %v3516_v46  ;;  %v2618_v22 = vrot.slane %v3937_v60, 9  ;;  %v932_v14 = vsel %vm4053_vm5, %v930_v42, %v931_v17  ;;  %v942_v29 = vrot.slane %v3998_v62, 5  ;;  %v2613_v52 = vrot.slane %v3815_v12, 9  ;;  %v3536_v17 = vld [vmem:[%s4484_s1 + $0xb8] sm:$0xff]  }
  0x54   : > { %3157 = vmatprep.subr.bf16.mxu0 %v3517_v35  ;;  %v925_v8 = vsel %vm4053_vm5, %v923_v28, %v924_v34  ;;  %v2619_v53 = vrot.slane %v3960_v18, 9  ;;  %v893_v54 = vrot.slane %v3818_v13, 5  ;;  %v937_v12 = vrot.slane %v935_v47, 4 }
  0x55   : > { %3014 = vmatmul.mubr.bf16.vlgmr.msra.gmra.mrb[0].mxu1 %v4103_v2  ;;  %v929_v23 = vsel %vm4053_vm5, %v2618_v22, %v928_v15  ;;  %v4171_v58 = vcombine.low %v922_v7, %v925_v8  ;;  %v2620_v13 = vrot.slane %v3994_v57, 9  ;;  %v944_v6 = vrot.slane %v942_v29, 4  ;;  %v3534_v22 = vld [vmem:[%s4484_s1 + $0xb0] sm:$0xff]   ;;  %v3539_v7 = vld [vmem:[%s4484_s1 + $0x1c0] sm:$0xff]   ;;  %v3541_v8 = vld [vmem:[%s4484_s1 + $0x1c8] sm:$0xff]  }
  0x56   : > { %3030 = vmatpush3.bf16.msra.mxu1 %v3516_v46  ;;  %3017 = vmatprep.mubr.bf16.mxu1 %v4108_v5  ;;  %v3528_v46 = vld [vmem:[%s4484_s1 + $0xa0] sm:$0xff]   ;;  %v4181_v1 = vcombine.low %v929_v23, %v932_v14  ;;  %v894_v51 = vsel %vm4053_vm5, %v2613_v52, %v893_v54  ;;  %v895_v55 = vrot.slane %v893_v54, 4  ;;  %v945_v9 = vrot.slane %v4001_v63, 5  ;;  %v3543_v23 = vld [vmem:[%s4484_s1 + $0x1d0] sm:$0xff]   ;;  %v3545_v14 = vld [vmem:[%s4484_s1 + $0x1d8] sm:$0xff]  }
  0x57   : > { %3031 = vmatprep.subr.bf16.mxu1 %v3518_v21  ;;  %v4196_v24 = vcombine.low %v3960_v18, %v3966_v26  ;;  %v936_v63 = vsel %vm4053_vm5, %v2619_v53, %v935_v47  ;;  %v1550_v41 = vrot.slane %v4031_v38, 5  ;;  %v3529_v18 = vld [vmem:[%s4484_s1 + $0x1a0] sm:$0xff]   ;;  %v943_v26 = vsel %vm4053_vm5, %v2620_v13, %v942_v29  ;;  %v3531_v38 = vld [vmem:[%s4484_s1 + $0x1a8] sm:$0xff]   ;;  %v3553_v13 = vld [vmem:[%s4484_s1 + $0x1f0] sm:$0xff]  }
  0x58   : > { %3142 = vmatmul.mubr.bf16.vlgmr.msra.gmra.mrb[0].mxu0 %v4125_v16  ;;  %v946_v15 = vsel %vm4053_vm5, %v944_v6, %v945_v9  ;;  %v2703_v20 = vrot.slane %v4019_v33, 9  ;;  %v4230_v42 = vcombine.low %v3994_v57, %v3998_v62  ;;  %v3535_v57 = vld [vmem:[%s4484_s1 + $0x1b0] sm:$0xff]   ;;  %v3538_v47 = vld [vmem:[%s4484_s1 + $0xc0] sm:$0xff]   ;;  %v3548_v52 = vld [vmem:[%s4484_s1 + $0xe8] sm:$0xff]  }
  0x59   : > { %3158 = vmatpush3.bf16.msra.mxu0 %v3517_v35  ;;  %3145 = vmatprep.mubr.bf16.mxu0 %v4132_v32  ;;  %v938_v35 = vrot.slane %v3969_v27, 5  ;;  %v897_v27 = vsel %vm4053_vm5, %v895_v55, %v896_v50  ;;  %v4222_v28 = vcombine.low %v943_v26, %v946_v15  ;;  %v1552_v34 = vrot.slane %v1550_v41, 4  ;;  %v3540_v50 = vld [vmem:[%s4484_s1 + $0xc8] sm:$0xff]   ;;  %v3546_v29 = vld [vmem:[%s4484_s1 + $0xe0] sm:$0xff]   ;;  %v3555_v55 = vld [vmem:[%s4484_s1 + $0x1f8] sm:$0xff]  }
  0x5a   : > { %3032 = vmatpush3.bf16.msra.mxu1 %v3518_v21  ;;  %3159 = vmatprep.subr.bf16.mxu0 %v3519_v19  ;;  %v4189_v21 = vcombine.low %v3937_v60, %v3940_v61  ;;  %v2637_v40 = vcombine.low %v894_v51, %v897_v27  ;;  %v3530_v61 = vld [vmem:[%s4484_s1 + $0xa8] sm:$0xff]   ;;  %v1551_v33 = vsel %vm4053_vm5, %v2703_v20, %v1550_v41  ;;  %v3547_v53 = vld [vmem:[%s4484_s1 + $0x1e0] sm:$0xff]   ;;  %v3562_v20 = vld [vmem:[%s4484_s1 + $0x230] sm:$0xff]  }
  0x5b   : > { %3033 = vmatprep.subr.bf16.mxu1 %v3522_v4  ;;  %v939_v60 = vsel %vm4053_vm5, %v937_v12, %v938_v35  ;;  %v3549_v54 = vld [vmem:[%s4484_s1 + $0x1e8] sm:$0xff]   ;;  %v4307_v12 = vld [vmem:[%s3806_s15 + $0x70] sm:$0xf]  ;;  %v3554_v35 = vld [vmem:[%s4484_s1 + $0xf8] sm:$0xff]  }
  0x5c   : > { %v3556_v6 = vld [vmem:[%s4484_s1 + $0x200] sm:$0xff]   ;;  %v1935_v27 = vshrl.u32 %v4307_v12, 16  ;;  %v2130_v36 = vrot.slane %v4307_v12, 5 }
  0x5d   : > { %3018 = vmatmul.mubr.bf16.gmra.mrb[4].mxu1 %v4142_v45  ;;  %3160 = vmatpush3.bf16.msra.mxu0 %v3519_v19  ;;  %v4215_v19 = vcombine.low %v936_v63, %v939_v60 }
  0x5e   : > { %3034 = vmatpush3.bf16.msra.mxu1 %v3522_v4  ;;  %3021 = vmatprep.mubr.bf16.mxu1 %v4150_v49  ;;  %v1553_v4 = vrot.slane %v4034_v39, 5  ;;  %v1937_v60 = vrot.slane %v1935_v27, 4 }
  0x5f   : > { %3035 = vmatprep.subr.bf16.mxu1 %v3524_v0  ;;  %3161 = vmatprep.subr.bf16.mxu0 %v3523_v30 }
  0x60   : > { %3146 = vmatmul.mubr.bf16.gmra.mrb[4].mxu0 %v4171_v58  ;;  %v1554_v39 = vsel %vm4053_vm5, %v1552_v34, %v1553_v4 }
  0x61   : > { %3162 = vmatpush3.bf16.msra.mxu0 %v3523_v30  ;;  %3149 = vmatprep.mubr.bf16.mxu0 %v4181_v1  ;;  %v4245_v62 = vcombine.low %v1551_v33, %v1554_v39  ;;  %v3537_v30 = vld [vmem:[%s4484_s1 + $0x1b8] sm:$0xff]  }
  0x62   : > { %3036 = vmatpush3.bf16.msra.mxu1 %v3524_v0  ;;  %3163 = vmatprep.subr.bf16.mxu0 %v3525_v37  ;;  %v3542_v0 = vld [vmem:[%s4484_s1 + $0xd0] sm:$0xff]  }
  0x63   : > { %3037 = vmatprep.subr.bf16.mxu1 %v3528_v46 }
  0x65   : > { %3022 = vmatmul.mubr.bf16.gmra.mrb[8].mxu1 %v4189_v21  ;;  %3164 = vmatpush3.bf16.msra.mxu0 %v3525_v37  ;;  %v3551_v37 = vld [vmem:[%s4484_s1 + $0xf0] sm:$0xff]  }
  0x66   : > { %3038 = vmatpush3.bf16.msra.mxu1 %v3528_v46  ;;  %3025 = vmatprep.mubr.bf16.mxu1 %v4196_v24  ;;  %v4304_v46 = vld [vmem:[%s3806_s15 + $0x6c] sm:$0xf] }
  0x67   : > { %3039 = vmatprep.subr.bf16.mxu1 %v3530_v61  ;;  %3165 = vmatprep.subr.bf16.mxu0 %v3529_v18  ;;  %v2745_v51 = vcombine.low %v4304_v46, %v4307_v12  ;;  %v1922_v9 = vshrl.u32 %v4304_v46, 16 }
  0x68   : > { %3150 = vmatmul.mubr.bf16.gmra.mrb[8].mxu0 %v4215_v19 }
  0x69   : > { %3166 = vmatpush3.bf16.msra.mxu0 %v3529_v18  ;;  %3153 = vmatprep.mubr.bf16.mxu0 %v4222_v28 }
  0x6a   : > { %3040 = vmatpush3.bf16.msra.mxu1 %v3530_v61  ;;  %3167 = vmatprep.subr.bf16.mxu0 %v3531_v38  ;;  %v281_v61 = vld [vmem:[%s3806_s15 + $0x74] sm:$0x1]  ;;  %s3571_s15 = scalar_lea.vmem %s3570_s12, 512 }
  0x6b   : > { %3041 = vmatprep.subr.bf16.mxu1 %v3534_v22  ;;  %v1941_v18 = vshll.u32 %v281_v61, 16  ;;  %v2133_v4 = vrot.slane %v281_v61, 5  ;;  %p3573_p5 = scmp.lt.s32.totalorder %s3571_s15, %s3565_s10 }
  0x6d   : > { %3026 = vmatmul.mubr.bf16.gmra.mrb[12].mxu1 %v4230_v42  ;;  %3168 = vmatpush3.bf16.msra.mxu0 %v3531_v38  ;;  %v1943_v38 = vrot.slane %v1941_v18, 5  ;;  %p3574_p6 = por %p3573_p5, %p3572_p4 }
  0x6e   : > { %3042 = vmatpush3.bf16.msra.mxu1 %v3534_v22  ;;  %3045 = vmatprep.mubr.bf16.mxu1 %v2637_v40 }
  0x6f   : > { %3043 = vmatprep.subr.bf16.mxu1 %v3536_v17  ;;  %3169 = vmatprep.subr.bf16.mxu0 %v3535_v57  ;;  %p3575_p7 = pnand %p3574_p6, %p3568_p2 }
  0x70   : > { %3154 = vmatmul.mubr.bf16.gmra.mrb[12].mxu0 %v4245_v62 }
  0x71   : > { %3170 = vmatpush3.bf16.msra.mxu0 %v3535_v57  ;;  %3173 = vmatprep.mubr.bf16.mxu0 %v4108_v5 }
  0x72   : > { %3044 = vmatpush3.bf16.msra.mxu1 %v3536_v17  ;;  %3171 = vmatprep.subr.bf16.mxu0 %v3537_v30 }
  0x73   : > { %3061 = vmatprep.subr.bf16.mxu1 %v3538_v47 }
  0x75   : > { %3046 = vmatmul.mubr.bf16.vlgmr.msra.gmra.mrb[0].mxu1 %v4088_v56  ;;  %3172 = vmatpush3.bf16.msra.mxu0 %v3537_v30  ;;  %v3544_v56 = vld [vmem:[%s4484_s1 + $0xd8] sm:$0xff]  }
  0x76   : > { %3062 = vmatpush3.bf16.msra.mxu1 %v3538_v47  ;;  %3049 = vmatprep.mubr.bf16.mxu1 %v4125_v16 }
  0x77   : > { %3063 = vmatprep.subr.bf16.mxu1 %v3540_v50  ;;  %3189 = vmatprep.subr.bf16.mxu0 %v3539_v7 }
  0x78   : > { %3174 = vmatmul.mubr.bf16.vlgmr.msra.gmra.mrb[0].mxu0 %v4142_v45 }
  0x79   : > { %3190 = vmatpush3.bf16.msra.mxu0 %v3539_v7  ;;  %3177 = vmatprep.mubr.bf16.mxu0 %v4150_v49 }
  0x7a   : > { %3064 = vmatpush3.bf16.msra.mxu1 %v3540_v50  ;;  %3191 = vmatprep.subr.bf16.mxu0 %v3541_v8 }
  0x7b   : > { %3065 = vmatprep.subr.bf16.mxu1 %v3542_v0 }
  0x7d   : > { %3050 = vmatmul.mubr.bf16.gmra.mrb[4].mxu1 %v4132_v32  ;;  %3192 = vmatpush3.bf16.msra.mxu0 %v3541_v8 }
  0x7e   : > { %3066 = vmatpush3.bf16.msra.mxu1 %v3542_v0  ;;  %3053 = vmatprep.mubr.bf16.mxu1 %v4171_v58 }
  0x7f   : > { %3067 = vmatprep.subr.bf16.mxu1 %v3544_v56  ;;  %3193 = vmatprep.subr.bf16.mxu0 %v3543_v23 }
  0x80   : > { %3178 = vmatmul.mubr.bf16.gmra.mrb[4].mxu0 %v4189_v21 }
  0x81   : > { %3194 = vmatpush3.bf16.msra.mxu0 %v3543_v23  ;;  %3181 = vmatprep.mubr.bf16.mxu0 %v4196_v24 }
  0x82   : > { %3068 = vmatpush3.bf16.msra.mxu1 %v3544_v56  ;;  %3195 = vmatprep.subr.bf16.mxu0 %v3545_v14 }
  0x83   : > { %3069 = vmatprep.subr.bf16.mxu1 %v3546_v29 }
  0x85   : > { %3054 = vmatmul.mubr.bf16.gmra.mrb[8].mxu1 %v4181_v1  ;;  %3196 = vmatpush3.bf16.msra.mxu0 %v3545_v14  ;;  %v4385_v14 = vld [vmem:[%s4485_s2] ss:$0 sm:$0xff] }
  0x86   : > { %3070 = vmatpush3.bf16.msra.mxu1 %v3546_v29  ;;  %3057 = vmatprep.mubr.bf16.mxu1 %v4215_v19 }
  0x87   : > { %3071 = vmatprep.subr.bf16.mxu1 %v3548_v52  ;;  %3197 = vmatprep.subr.bf16.mxu0 %v3547_v53 }
  0x88   : > { %3182 = vmatmul.mubr.bf16.gmra.mrb[8].mxu0 %v4230_v42 }
  0x89   : > { %3198 = vmatpush3.bf16.msra.mxu0 %v3547_v53  ;;  %3185 = vmatprep.mubr.bf16.mxu0 %v4080_v25 }
  0x8a   : > { %3072 = vmatpush3.bf16.msra.mxu1 %v3548_v52  ;;  %3199 = vmatprep.subr.bf16.mxu0 %v3549_v54 }
  0x8b   : > { %3073 = vmatprep.subr.bf16.mxu1 %v3551_v37 }
  0x8d   : > { %3058 = vmatmul.mubr.bf16.gmra.mrb[12].mxu1 %v4222_v28  ;;  %3200 = vmatpush3.bf16.msra.mxu0 %v3549_v54 }
  0x8e   : > { %3074 = vmatpush3.bf16.msra.mxu1 %v3551_v37  ;;  %3077 = vmatprep.mubr.bf16.mxu1 %v4103_v2  ;;  %v3557_v2 = vld [vmem:[%s4484_s1 + $0x208] sm:$0xff]  }
  0x8f   : > { %3075 = vmatprep.subr.bf16.mxu1 %v3554_v35  ;;  %3201 = vmatprep.subr.bf16.mxu0 %v3553_v13 }
  0x90   : > { %3186 = vmatmul.mubr.bf16.gmra.mrb[12].mxu0 %v2745_v51 }
  0x91   : > { %3202 = vmatpush3.bf16.msra.mxu0 %v3553_v13  ;;  %3205 = vmatprep.mubr.bf16.mxu0 %v3923_v43  ;;  %v1925_v43 = vshll.u32 %v4304_v46, 16 }
  0x92   : > { %3076 = vmatpush3.bf16.msra.mxu1 %v3554_v35  ;;  %3203 = vmatprep.subr.bf16.mxu0 %v3555_v55 }
  0x93   : > { %v1927_v40 = vrot.slane %v1925_v43, 5 }
  0x95   : > { %3078 = vmatmul.mubr.bf16.vlgmr.msra.gmra.mrb[0].mxu1 %v4108_v5  ;;  %3204 = vmatpush3.bf16.msra.mxu0 %v3555_v55  ;;  %v1931_v5 = vshll.u32 %v4307_v12, 16 }
  0x96   : > { %3081 = vmatprep.mubr.bf16.mxu1 %v4142_v45  ;;  %3221 = vmatprep.subr.bf16.mxu0 %v3556_v6  ;;  %v3558_v45 = vld [vmem:[%s4484_s1 + $0x210] sm:$0xff]  }
  0x97   : > { %v1933_v63 = vrot.slane %v1931_v5, 5 }
  0x98   : > { %3206 = vmatmul.mubr.bf16.vlgmr.msra.gmra.mrb[0].mxu0 %v3951_v3  ;;  %v1924_v3 = vrot.slane %v1922_v9, 4 }
  0x99   : > { %3222 = vmatpush3.bf16.msra.mxu0 %v3556_v6  ;;  %3209 = vmatprep.mubr.bf16.mxu0 %v3984_v44  ;;  %v3559_v44 = vld [vmem:[%s4484_s1 + $0x218] sm:$0xff]  }
  0x9a   : > { %3223 = vmatprep.subr.bf16.mxu0 %v3557_v2  ;;  %v1928_v41 = vor.u32 %v1927_v40, %v1924_v3 }
  0x9c   : > { %v1929_v26 = vrot.slane %v1928_v41, 4 }
  0x9d   : > { %3082 = vmatmul.mubr.bf16.gmra.mrb[4].mxu1 %v4150_v49  ;;  %3224 = vmatpush3.bf16.msra.mxu0 %v3557_v2  ;;  %v1938_v49 = vor.u32 %v1937_v60, %v1933_v63 }
  0x9e   : > { %3085 = vmatprep.mubr.bf16.mxu1 %v4189_v21  ;;  %3225 = vmatprep.subr.bf16.mxu0 %v3558_v45  ;;  %v3560_v21 = vld [vmem:[%s4484_s1 + $0x220] sm:$0xff]  }
  0x9f   : > { %v1939_v15 = vrot.slane %v1938_v49, 4 }
  0xa0   : > { %3210 = vmatmul.mubr.bf16.gmra.mrb[4].mxu0 %v4012_v11  ;;  %v3561_v11 = vld [vmem:[%s4484_s1 + $0x228] sm:$0xff]  }
  0xa1   : > { %3226 = vmatpush3.bf16.msra.mxu0 %v3558_v45  ;;  %3213 = vmatprep.mubr.bf16.mxu0 %v4038_v48  ;;  %v1934_v48 = vsel %vm3852_vm2, %v1929_v26, %v1933_v63  ;;  %v3661_v63 = vmov 0.0  }
  0xa2   : > { %3227 = vmatprep.subr.bf16.mxu0 %v3559_v44  ;;  %3253 = vmatprep.subr.bf16.mxu1 %v3661_v63 }
  0xa5   : > { %3086 = vmatmul.mubr.bf16.gmra.mrb[8].mxu1 %v4196_v24  ;;  %3228 = vmatpush3.bf16.msra.mxu0 %v3559_v44  ;;  %v1944_v24 = vsel %vm3852_vm2, %v1939_v15, %v1943_v38 }
  0xa6   : > { %3089 = vmatprep.mubr.bf16.mxu1 %v4230_v42  ;;  %3229 = vmatprep.subr.bf16.mxu0 %v3560_v21  ;;  %v2770_v34 = vcombine.low %v1934_v48, %v1944_v24 }
  0xa8   : > { %3214 = vmatmul.mubr.bf16.gmra.mrb[8].mxu0 %v4062_v31  ;;  %v3563_v31 = vld [vmem:[%s4484_s1 + $0x238] sm:$0xff]  }
  0xa9   : > { %3230 = vmatpush3.bf16.msra.mxu0 %v3560_v21  ;;  %3217 = vmatprep.mubr.bf16.mxu0 %v4091_v59  ;;  %v2132_v59 = vrot.slane %v2130_v36, 4 }
  0xaa   : > { %3231 = vmatprep.subr.bf16.mxu0 %v3561_v11 }
  0xad   : > { %3090 = vmatmul.mubr.bf16.gmra.mrb[12].mxu1 %v4080_v25  ;;  %3232 = vmatpush3.bf16.msra.mxu0 %v3561_v11  ;;  %v2779_v25 = vrot.slane %v4304_v46, 9 }
  0xae   : > { %3233 = vmatprep.subr.bf16.mxu0 %v3562_v20  ;;  %3269 = vmatprep.mubr.msk.bf16.mxu1 %vm3662_vm6, %v3661_v63 }
  0xb0   : > { %3218 = vmatmul.mubr.bf16.gmra.mrb[12].mxu0 %v2770_v34 }
  0xb1   : > { %3234 = vmatpush3.bf16.msra.mxu0 %v3562_v20  ;;  %3237 = vmatprep.mubr.bf16.mxu0 %v4125_v16  ;;  %v2131_v16 = vsel %vm4053_vm5, %v2779_v25, %v2130_v36 }
  0xb2   : > { %3235 = vmatprep.subr.bf16.mxu0 %v3563_v31 }
  0xb5   : > { %3236 = vmatpush3.bf16.msra.mxu0 %v3563_v31 }
  0xb8   : > { %3238 = vmatmul.mubr.bf16.vlgmr.msra.gmra.mrb[0].mxu0 %v4132_v32  ;;  %v2134_v32 = vsel %vm4053_vm5, %v2132_v59, %v2133_v4 }
  0xb9   : > { %3241 = vmatprep.mubr.bf16.mxu0 %v4171_v58  ;;  %v2796_v58 = vcombine.low %v2131_v16, %v2134_v32 }
  0xc0   : > { %3242 = vmatmul.mubr.bf16.gmra.mrb[4].mxu0 %v4181_v1 }
  0xc1   : > { %3245 = vmatprep.mubr.bf16.mxu0 %v4215_v19 }
  0xc8   : > { %3246 = vmatmul.mubr.bf16.gmra.mrb[8].mxu0 %v4222_v28 }
  0xc9   : > { %3249 = vmatprep.mubr.bf16.mxu0 %v4245_v62 }
  0xd0   : > { %3250 = vmatmul.mubr.bf16.gmra.mrb[12].mxu0 %v2796_v58 }
 0x168   : > { %v3079_v1 = vpop.f32.mrb[0].mxu1 }
 0x169   : > { %v1262_v19 = vpop.f32.mrb[1].mxu1 }
 0x16a   : > { %v3080_v22 = vpop.f32.mrb[2].mxu1 }
 0x16b   : > { %v1265_v42 = vpop.f32.mrb[3].mxu1 }
 0x170   : > { %v3083_v33 = vpop.f32.mrb[4].mxu1 }
 0x171   : > { %v1278_v39 = vpop.f32.mrb[5].mxu1 }
 0x172   : > { %v3084_v17 = vpop.f32.mrb[6].mxu1 }
 0x173   : > { %v1281_v57 = vpop.f32.mrb[7].mxu1 }
 0x178   : > { %v3087_v30 = vpop.f32.mrb[8].mxu1 }
 0x179   : > { %v1294_v28 = vpop.f32.mrb[9].mxu1 }
 0x17a   : > { %v3088_v47 = vpop.f32.mrb[10].mxu1 }
 0x17b   : > { %v1297_v62 = vpop.f32.mrb[11].mxu1 }
 0x180   : > { %v3091_v50 = vpop.f32.mrb[12].mxu1 }
 0x181   : > { %v1310_v7 = vpop.f32.mrb[13].mxu1 }
 0x182   : > { %v3092_v8 = vpop.f32.mrb[14].mxu1 }
 0x183   : > { %v1313_v0 = vpop.f32.mrb[15].mxu1 }
 0x18b   : > { %v3239_v10 = vpop.f32.mrb[0].mxu0 }
 0x18c   : > { %v3273_v56 = vadd.f32 %v3239_v10, %v3079_v1  ;;  %v2238_v23 = vpop.f32.mrb[1].mxu0 }
 0x18d   : > { %v3274_v29 = vadd.f32 %v2238_v23, %v1262_v19  ;;  %v3240_v52 = vpop.f32.mrb[2].mxu0  ;;  %v2398_v23 = vld [vmem:[%s4487_s4] sm:$0xff] }
 0x18e   : > { %v3275_v53 = vadd.f32 %v3240_v52, %v3080_v22  ;;  %v2241_v54 = vpop.f32.mrb[3].mxu0  ;;  %v2326_v43 = vadd.f32 %v3273_v56, %v4385_v14  ;;  %v2399_v52 = vld [vmem:[%s4487_s4 + $0x8] sm:$0xff] }
 0x18f   : > { %v3276_v37 = vadd.f32 %v2241_v54, %v1265_v42  ;;  %v2324_v46 = vadd.f32 %v3274_v29, %v4385_v14  ;;  %v3663_v29 = vmov 0  }
 0x190   : > { %v2342_v3 = vmax.f32 %v2326_v43, 0.0  ;;  %v2327_v40 = vadd.f32 %v3275_v53, %v4385_v14  ;;  %3480 = vset.pattern.permute.xlu1 %v3663_v29 }
 0x191   : > { %v2340_v12 = vmax.f32 %v2324_v46, 0.0  ;;  %v2325_v35 = vadd.f32 %v3276_v37, %v4385_v14  ;;  %2402 = vperm.xlu1 %3480, %v2398_v23  }
 0x192   : > { %v2343_v18 = vmax.f32 %v2327_v40, 0.0 }
 0x193   : > { %v3243_v13 = vpop.f32.mrb[4].mxu0  ;;  %2356 = vxpose.xlu0.b32.start [1/16] %v2340_v12, 128  ;;  %v2341_v9 = vmax.f32 %v2325_v35, 0.0 }
 0x194   : > { %v3277_v51 = vadd.f32 %v3243_v13, %v3083_v33  ;;  %v2254_v55 = vpop.f32.mrb[5].mxu0 }
 0x195   : > { %v3278_v6 = vadd.f32 %v2254_v55, %v1278_v39  ;;  %v3244_v2 = vpop.f32.mrb[6].mxu0  ;;  %2407 = vperm.xlu1 %3480, %v2399_v52  }
 0x196   : > { %v3279_v27 = vadd.f32 %v3244_v2, %v3084_v17  ;;  %v2257_v5 = vpop.f32.mrb[7].mxu0  ;;  %v2330_v59 = vadd.f32 %v3277_v51, %v4385_v14 }
 0x197   : > { %v3280_v45 = vadd.f32 %v2257_v5, %v1281_v57  ;;  %2357 = vxpose.xlu0.b32.cont [2/16] %v2341_v9, 128  ;;  %v2328_v21 = vadd.f32 %v3278_v6, %v4385_v14 }
 0x198   : > { %v2346_v58 = vmax.f32 %v2330_v59, 0.0  ;;  %v2331_v1 = vadd.f32 %v3279_v27, %v4385_v14 }
 0x199   : > { %v2344_v11 = vmax.f32 %v2328_v21, 0.0  ;;  %v2329_v48 = vadd.f32 %v3280_v45, %v4385_v14 }
 0x19a   : > { %v2347_v19 = vmax.f32 %v2331_v1, 0.0 }
 0x19b   : > { %v3247_v60 = vpop.f32.mrb[8].mxu0  ;;  %2358 = vxpose.xlu0.b32.cont [3/16] %v2342_v3, 128  ;;  %v2345_v25 = vmax.f32 %v2329_v48, 0.0 }
 0x19c   : > { %v3281_v44 = vadd.f32 %v3247_v60, %v3087_v30  ;;  %v2270_v61 = vpop.f32.mrb[9].mxu0 }
 0x19d   : > { %v3282_v41 = vadd.f32 %v2270_v61, %v1294_v28  ;;  %v3248_v49 = vpop.f32.mrb[10].mxu0 }
 0x19e   : > { %v3283_v26 = vadd.f32 %v3248_v49, %v3088_v47  ;;  %v2273_v15 = vpop.f32.mrb[11].mxu0  ;;  %v2334_v17 = vadd.f32 %v3281_v44, %v4385_v14 }
 0x19f   : > { %v3284_v38 = vadd.f32 %v2273_v15, %v1297_v62  ;;  %2359 = vxpose.xlu0.b32.cont [4/16] %v2343_v18, 128  ;;  %v2332_v22 = vadd.f32 %v3282_v41, %v4385_v14  ;;  %v3564_v18 = vld [vmem:[%s4486_s3] sm:$0xff]  }
 0x1a0   : > { %v2350_v57 = vmax.f32 %v2334_v17, 0.0  ;;  %v2335_v30 = vadd.f32 %v3283_v26, %v4385_v14 }
 0x1a1   : > { %v2348_v42 = vmax.f32 %v2332_v22, 0.0  ;;  %v2333_v33 = vadd.f32 %v3284_v38, %v4385_v14 }
 0x1a2   : > { %v2351_v28 = vmax.f32 %v2335_v30, 0.0 }
 0x1a3   : > { %v3251_v24 = vpop.f32.mrb[12].mxu0  ;;  %2360 = vxpose.xlu0.b32.cont [5/16] %v2344_v11, 128  ;;  %v2349_v39 = vmax.f32 %v2333_v33, 0.0 }
 0x1a4   : > { %v3285_v20 = vadd.f32 %v3251_v24, %v3091_v50  ;;  %v2286_v34 = vpop.f32.mrb[13].mxu0 }
 0x1a5   : > { %v3286_v31 = vadd.f32 %v2286_v34, %v1310_v7  ;;  %v3252_v36 = vpop.f32.mrb[14].mxu0 }
 0x1a6   : > { %v3287_v4 = vadd.f32 %v3252_v36, %v3092_v8  ;;  %v2289_v16 = vpop.f32.mrb[15].mxu0  ;;  %v2338_v8 = vadd.f32 %v3285_v20, %v4385_v14 }
 0x1a7   : > { %v3288_v32 = vadd.f32 %v2289_v16, %v1313_v0  ;;  %2361 = vxpose.xlu0.b32.cont [6/16] %v2345_v25, 128  ;;  %v2336_v47 = vadd.f32 %v3286_v31, %v4385_v14 }
 0x1a8   : > { %v2354_v0 = vmax.f32 %v2338_v8, 0.0  ;;  %v2339_v10 = vadd.f32 %v3287_v4, %v4385_v14 }
 0x1a9   : > { %v2352_v62 = vmax.f32 %v2336_v47, 0.0  ;;  %v2337_v50 = vadd.f32 %v3288_v32, %v4385_v14 }
 0x1aa   : > { %v2355_v56 = vmax.f32 %v2339_v10, 0.0 }
 0x1ab   : > { %2362 = vxpose.xlu0.b32.cont [7/16] %v2346_v58, 128  ;;  %v2353_v7 = vmax.f32 %v2337_v50, 0.0 }
 0x1af   : > { %2363 = vxpose.xlu0.b32.cont [8/16] %v2347_v19, 128 }
 0x1b3   : > { %2364 = vxpose.xlu0.b32.cont [9/16] %v2348_v42, 128 }
 0x1b7   : > { %2365 = vxpose.xlu0.b32.cont [10/16] %v2349_v39, 128 }
 0x1bb   : > { %2366 = vxpose.xlu0.b32.cont [11/16] %v2350_v57, 128 }
 0x1bf   : > { %2367 = vxpose.xlu0.b32.cont [12/16] %v2351_v28, 128 }
 0x1c3   : > { %2368 = vxpose.xlu0.b32.cont [13/16] %v2352_v62, 128 }
 0x1c7   : > { %2369 = vxpose.xlu0.b32.cont [14/16] %v2353_v7, 128 }
 0x1cb   : > { %2370 = vxpose.xlu0.b32.cont [15/16] %v2354_v0, 128 }
 0x1cf   : > { %2371 = vxpose.xlu0.b32.end [16/16] %v2355_v56, 128 }
 0x1f8   : > { %3481 = vset.pattern.permute.xlu0 %v3663_v29 }
 0x210   : > { %v2403_v21 = vpop.permute.xlu1 %2402 }
 0x213   : > { %v2372_v14 = vpop.trf.xlu0 }
 0x214   : > { %v2408_v38 = vpop.permute.xlu1 %2407 }
 0x217   : > { %v2373_v53 = vpop.trf.xlu0 }
 0x218   : > { %v2388_v54 = vpack.c.bf16 %v2373_v53, %v2372_v14 }
 0x21a   : > { %3254 = vmatpush3.bf16.msra.mxu1 %v2388_v54 }
 0x21b   : > { %v2374_v37 = vpop.trf.xlu0  ;;  %3255 = vmatprep.subr.bf16.mxu1 %v3661_v63 }
 0x21f   : > { %v2375_v46 = vpop.trf.xlu0 }
 0x220   : > { %v2389_v12 = vpack.c.bf16 %v2375_v46, %v2374_v37 }
 0x222   : > { %3256 = vmatpush3.bf16.msra.mxu1 %v2389_v12 }
 0x223   : > { %v2376_v35 = vpop.trf.xlu0  ;;  %3257 = vmatprep.subr.bf16.mxu1 %v3661_v63 }
 0x227   : > { %v2377_v13 = vpop.trf.xlu0 }
 0x228   : > { %v2390_v51 = vpack.c.bf16 %v2377_v13, %v2376_v35 }
 0x22a   : > { %3258 = vmatpush3.bf16.msra.mxu1 %v2390_v51 }
 0x22b   : > { %v2378_v55 = vpop.trf.xlu0  ;;  %3259 = vmatprep.subr.bf16.mxu1 %v3661_v63 }
 0x22f   : > { %v2379_v6 = vpop.trf.xlu0 }
 0x230   : > { %v2391_v2 = vpack.c.bf16 %v2379_v6, %v2378_v55 }
 0x232   : > { %3260 = vmatpush3.bf16.msra.mxu1 %v2391_v2 }
 0x233   : > { %v2380_v9 = vpop.trf.xlu0  ;;  %3261 = vmatprep.subr.bf16.mxu1 %v3661_v63 }
 0x237   : > { %v2381_v43 = vpop.trf.xlu0 }
 0x238   : > { %v2392_v27 = vpack.c.bf16 %v2381_v43, %v2380_v9 }
 0x23a   : > { %3262 = vmatpush3.bf16.msra.mxu1 %v2392_v27 }
 0x23b   : > { %v2382_v5 = vpop.trf.xlu0  ;;  %3263 = vmatprep.subr.bf16.mxu1 %v3661_v63 }
 0x23f   : > { %v2383_v45 = vpop.trf.xlu0 }
 0x240   : > { %v2393_v3 = vpack.c.bf16 %v2383_v45, %v2382_v5 }
 0x242   : > { %3264 = vmatpush3.bf16.msra.mxu1 %v2393_v3 }
 0x243   : > { %v2384_v40 = vpop.trf.xlu0  ;;  %3265 = vmatprep.subr.bf16.mxu1 %v3661_v63 }
 0x247   : > { %v2385_v60 = vpop.trf.xlu0 }
 0x248   : > { %v2394_v44 = vpack.c.bf16 %v2385_v60, %v2384_v40 }
 0x24a   : > { %3266 = vmatpush3.bf16.msra.mxu1 %v2394_v44 }
 0x24b   : > { %v2386_v61 = vpop.trf.xlu0  ;;  %3267 = vmatprep.subr.bf16.mxu1 %v3661_v63 }
 0x24f   : > { %v2387_v41 = vpop.trf.xlu0 }
 0x250   : > { %v2395_v49 = vpack.c.bf16 %v2387_v41, %v2386_v61 }
 0x252   : > { %3268 = vmatpush3.bf16.msra.mxu1 %v2395_v49 }
 0x255   : > { %3270 = vmatmul.mubr.bf16.vlgmr.msra.gmra.mrb[16].mxu1 %v3564_v18 }
 0x328   : > { %v2450_v26 = vpop.f32.mrb[16].mxu1 }
 0x329   : > { %v2451_v15 = vadd.f32 %v2450_v26, %v2403_v21  ;;  %v3271_v63 = vpop.f32.mrb[17].mxu1 }
 0x32a   : > { %v2453_v11 = vpop.f32.mrb[18].mxu1 }
 0x32b   : > { %2457 = vst [vmem:[%s241_s16] sm:$0xff] %v2451_v15  ;;  %v2454_v48 = vadd.f32 %v2453_v11, %v2408_v38  ;;  %v3272_v24 = vpop.f32.mrb[19].mxu1 }
 0x32d   : > { %2458 = vst [vmem:[%s241_s16 + $0x8] sm:$0xff] %v2454_v48 }
 0x32e   : > { %3578 = shalt.err (!%p3575_p7)
}
 0x32f   : > { %s3579_s13 = scalar_lea.hbm %s4429_s22, 256  ;;  %s3583_s17 = scalar_lea.hbm %s4488_s5, 1024 }
 0x330   : > { %p3580_p9 = scmp.ne.s32.totalorder %s4429_s22, %s3579_s13  ;;  %p3584_p12 = scmp.lt.u32.totalorder %s4429_s22, %s4488_s5 }
 0x331   : > { %p3585_p13 = scmp.lt.u32.totalorder %s3583_s17, %s3579_s13  ;;  %p3587_p1 = scmp.lt.u32.totalorder %s3579_s13, %s4429_s22 }
 0x332   : > { %p3581_p10 = pnand %p3580_p9, %p3749_p3 }
 0x333   : > { %p3586_p0 = por %p3585_p13, %p3584_p12 }
 0x334   : > { %p3582_p11 = pneg %p3581_p10 }
 0x335   : > { %p3588_p2 = por %p3587_p1, %p3586_p0 }
 0x337   : > { %p3589_p4 = pnand %p3588_p2, %p3582_p11 }
 0x339   : > { %3592 = shalt.err (!%p3589_p4)
}
 0x33a   : > { %s3665_s26 = smov 128   ;;  %s3666_s9 = smov 256  }
 0x33b   : > { %s3667_s10 = smov 8  }
 0x33c   : > { %3403 = dma.vmem_to_hbm [thread:$0]  (%p3749_p3), %s4424_s27, 256, %s4429_s22, %s4431_s21, %s3665_s26, %s3666_s9, %s3667_s10  }
 0x33d PF: > { %p3409_p5 = scmp.ge.s32.totalorder %s3659_s25, 2  ;;  %s2489_s8 = sand.u32 1, %s3631_s18  }
 0x33e   : > { %s2490_s12 = scalar_lea.sflag [#allocation3], %s2489_s8 }
 0x33f   : > { %p3406_p6 = pnand %p3409_p5, %p3758_p8 }
 0x341   : > { %3626 = dma.done.wait (!%p3406_p6), %s2490_s12, 256  }
 0x342   : > { %3628 = vsyncadd (!%p3406_p6), %s2490_s12, 4294967040  ;;  %s18_s25 = sadd.s32 1, %s3659_s25   ;;  %s4497_s6 = sld [smem:[#allocation5_spill]] }
 0x343   : > { %p15_p7 = scmp.ge.s32.totalorder %s18_s25, 6   ;;  %s4498_s18 = smov %s3635_s19 }
 0x344   : > { %s4499_s19 = smov %s3639_s20  ;;  %s4500_s20 = smov %s3767_s11 }
 0x345   : > { %s4501_s21 = smov %s3651_s23  ;;  %s4502_s22 = smov %s3655_s24 }
 0x346   : > { %s4503_s23 = smov %s4506_s28  ;;  %17 = sbr.rel (!%p15_p7) target bundleno = 5 (0x5), region = 83 }
 0x348   : > { %s4504_s24 = smov %s4497_s6 }
 0x34d   :  { %2495 = vsyncpa [#allocation3], 1 }
 0x34e   :  { %2497 = vsyncpa [#allocation3 + $0x1], 1 }

</bundles_post_ra>
